<compile_context>
chip_gen: v7x
topology: tpu7x:2x2x1
jax: 0.10.0
libtpu: 0.0.40
codegen_flags: <defaults>
</compile_context>

<pallas_src>
import math
import jax
import jax.numpy as jnp
from jax.experimental import pallas as pl
from jax.experimental.pallas import tpu as pltpu

# ---- deterministic, in-script GridMaker configuration (synthetic, small) ----
RESOLUTION = 0.5
DIMENSION = 7.5          # -> dim = 16, G = 4096 voxels
RADIUS_SCALE = 1.0
GRM = 1.0                                            # gaussian_radius_multiple
FRM = (1.0 + 2.0 * GRM * GRM) / (2.0 * GRM)          # final_radius_multiple = 1.5
_E = math.exp(-2.0 * GRM * GRM)
QA = _E * 4.0 * GRM * GRM
QB = -_E * (4.0 * GRM + 8.0 * GRM ** 3)
QC = _E * (4.0 * GRM ** 4 + 4.0 * GRM * GRM + 1.0)

_EPS_R = 1e-6            # guard for padded / zero radii


def _coords2grid_kernel(vox_ref, coords4_ref, atomc_ref, types_ref, out_ref):
    """One (batch, voxel-tile) grid step.

    vox_ref:     (4, TILE)  rows 0..2: voxel xyz, row 3: |v|^2
    coords4_ref: (1, N, 4)  cols 0..2: -2*coords, col 3: 1.0
    atomc_ref:   (1, N, 8)  cols: |c|^2, -2/r^2, 1/r, (r*GRM)^2, (r*FRM)^2, pad, pad, pad
    types_ref:   (1, T, N)  type weights, transposed (T, N)
    out_ref:     (1, T, TILE)
    """
    vox = vox_ref[...]                     # (4, TILE)
    c4 = coords4_ref[0]                    # (N, 4)
    ac = atomc_ref[0]                      # (N, 8)
    types_t = types_ref[0]                 # (T, N)

    # MXU: (N,4)@(4,TILE) = |v|^2 - 2 c.v ; add |c|^2 ; clamp tiny negative cancellation.
    m = jnp.dot(c4, vox, preferred_element_type=jnp.float32,
                precision=jax.lax.Precision.HIGHEST)          # (N, TILE)
    dsq = jnp.maximum(m + ac[:, 0:1], 0.0)                    # (N, TILE)

    gauss = jnp.exp(ac[:, 1:2] * dsq)                         # exp(-2 d^2 / r^2)
    q = jnp.sqrt(dsq) * ac[:, 2:3]                            # d / r (only used by quad branch)
    quad = (QA * q + QB) * q + QC
    dens = jnp.where(dsq <= ac[:, 3:4], gauss,
                     jnp.where(dsq < ac[:, 4:5], quad, 0.0))  # (N, TILE)

    # (T, N) @ (N, TILE) -> (T, TILE): splat every atom into every type channel
    out_ref[0] = jnp.dot(types_t, dens, preferred_element_type=jnp.float32)


def _voxel_positions(center, resolution, dimension):
    dim = int(round(dimension / resolution)) + 1
    origin = jnp.asarray(center, jnp.float32) - jnp.float32(dimension / 2.0)
    lin = jnp.arange(dim, dtype=jnp.float32) * jnp.float32(resolution)
    X, Y, Z = jnp.meshgrid(origin[0] + lin, origin[1] + lin, origin[2] + lin,
                           indexing="ij")
    voxpos = jnp.stack([X.reshape(-1), Y.reshape(-1), Z.reshape(-1)], axis=0)  # (3, G)
    return voxpos, dim


def _coords2grid_batched(center, coords, types, radii, *, resolution=RESOLUTION,
                         dimension=DIMENSION, tile=2048):
    B, N, _ = coords.shape
    T = types.shape[2]
    voxpos, dim = _voxel_positions(center, resolution, dimension)   # (3, G)
    G = dim ** 3
    if G % tile != 0:
        tile = G                                                    # fall back: one tile/batch

    coords = coords.astype(jnp.float32)
    types_t = jnp.transpose(types.astype(jnp.float32), (0, 2, 1))   # (B, T, N)
    r = jnp.maximum(radii.astype(jnp.float32) * RADIUS_SCALE, _EPS_R)  # (B, N), NaN guard

    # Voxel stream: xyz plus |v|^2 (row 3) so one matmul yields |v|^2 - 2 c.v.
    vsq = jnp.sum(voxpos * voxpos, axis=0, keepdims=True)           # (1, G)
    voxA = jnp.concatenate([voxpos, vsq], axis=0)                   # (4, G)

    # Coord stream baked for the MXU dsq trick.
    c4 = jnp.concatenate([-2.0 * coords, jnp.ones((B, N, 1), jnp.float32)], axis=-1)  # (B,N,4)

    # Per-atom constants hoisted out of the kernel.
    csq = jnp.sum(coords * coords, axis=-1)                         # (B, N)
    rinv = 1.0 / r
    zeros = jnp.zeros_like(r)
    atomc = jnp.stack([csq,
                       -2.0 * rinv * rinv,
                       rinv,
                       (r * GRM) ** 2,
                       (r * FRM) ** 2,
                       zeros, zeros, zeros], axis=-1)               # (B, N, 8)

    out_flat = pl.pallas_call(
        _coords2grid_kernel,
        out_shape=jax.ShapeDtypeStruct((B, T, G), jnp.float32),
        grid_spec=pltpu.PrefetchScalarGridSpec(
            num_scalar_prefetch=0,
            grid=(B, G // tile),
            in_specs=[
                pl.BlockSpec((4, tile), lambda b, g: (0, g)),
                pl.BlockSpec((1, N, 4), lambda b, g: (b, 0, 0)),
                pl.BlockSpec((1, N, 8), lambda b, g: (b, 0, 0)),
                pl.BlockSpec((1, T, N), lambda b, g: (b, 0, 0)),
            ],
            out_specs=pl.BlockSpec((1, T, tile), lambda b, g: (b, 0, g)),
        ),
        compiler_params=pltpu.CompilerParams(
            dimension_semantics=("parallel", "parallel")),
    )(voxA, c4, atomc, types_t)
    return out_flat.reshape(B, T, dim, dim, dim)


def coords2grid(center, coords, types, radii, *, resolution=RESOLUTION,
                dimension=DIMENSION):
    """Mirrors Coords2Grid.forward: batched (B,N,3)/(B,N,T)/(B,N) or unbatched."""
    if coords.ndim == 3 and types.ndim == 3 and radii.ndim == 2:
        if coords.shape[0] != types.shape[0] or coords.shape[0] != radii.shape[0]:
            raise RuntimeError("Inconsistent batch sizes in Coords2Grid inputs")
        return _coords2grid_batched(center, coords, types, radii,
                                    resolution=resolution, dimension=dimension)
    elif coords.ndim == 2 and types.ndim == 2 and radii.ndim == 1:
        out = _coords2grid_batched(center, coords[None], types[None], radii[None],
                                   resolution=resolution, dimension=dimension)
        return out[0]
    else:
        raise RuntimeError("Invalid input dimensions in forward of Coords2Grid")


def _coords2grid_ref(center, coords, types, radii, *, resolution=RESOLUTION,
                     dimension=DIMENSION):
    """Plain-JAX reference for verification (batched, direct subtraction)."""
    voxpos, dim = _voxel_positions(center, resolution, dimension)   # (3, G)
    vox = voxpos.T                                                   # (G, 3)

    def one(c, t, r):
        d = vox[None, :, :] - c[:, None, :]                          # (N, G, 3)
        dsq = jnp.sum(d * d, axis=-1)                                # (N, G)
        dist = jnp.sqrt(dsq)
        rr = jnp.maximum(r * RADIUS_SCALE, _EPS_R)[:, None]
        gauss = jnp.exp(-2.0 * dsq / (rr * rr))
        q = dist / rr
        quad = (QA * q + QB) * q + QC
        dens = jnp.where(dist <= rr * GRM, gauss,
                         jnp.where(dist < rr * FRM, quad, 0.0))
        return (t.T @ dens).reshape(t.shape[1], dim, dim, dim)

    return jax.vmap(one)(coords.astype(jnp.float32),
                         types.astype(jnp.float32),
                         radii.astype(jnp.float32))


if __name__ == "__main__":
    key = jax.random.PRNGKey(0)
    kc, kt, kr = jax.random.split(key, 3)
    B, N, T = 2, 8, 4
    center = (0.0, 0.0, 0.0)

    coords = jax.random.uniform(kc, (B, N, 3), jnp.float32, minval=-3.0, maxval=3.0)
    types = jax.random.uniform(kt, (B, N, T), jnp.float32)
    radii = jax.random.uniform(kr, (B, N), jnp.float32, minval=1.0, maxval=2.0)

    # batched path
    out = jax.block_until_ready(coords2grid(center, coords, types, radii))
    ref = _coords2grid_ref(center, coords, types, radii)
    assert out.shape == (B, T, 16, 16, 16), out.shape
    # tolerance slightly looser than before: dsq is now formed via |v|^2+|c|^2-2c.v on the MXU,
    # which differs from direct subtraction by a few ULPs near the (continuous) branch cutoffs.
    assert jnp.allclose(out, ref, rtol=1e-3, atol=1e-3), float(jnp.max(jnp.abs(out - ref)))

    # unbatched path
    out1 = jax.block_until_ready(coords2grid(center, coords[0], types[0], radii[0]))
    assert out1.shape == (T, 16, 16, 16)
    assert jnp.allclose(out1, ref[0], rtol=1e-3, atol=1e-3)

    print("KERNEL_OK")
</pallas_src>

<mosaic_0001>
module attributes {stable_mosaic.version = 11 : i64} {
  func.func @_coords2grid_kernel(%arg0: i32, %arg1: i32, %arg2: memref<4x2048xf32, #tpu.memory_space<vmem>>, %arg3: memref<1x8x4xf32, #tpu.memory_space<vmem>>, %arg4: memref<1x8x8xf32, #tpu.memory_space<vmem>>, %arg5: memref<1x4x8xf32, #tpu.memory_space<vmem>>, %arg6: memref<1x4x2048xf32, #tpu.memory_space<vmem>>) attributes {dimension_semantics = [#tpu.dimension_semantics<parallel>, #tpu.dimension_semantics<parallel>], iteration_bounds = array<i64: 2, 2>, scalar_prefetch = 0 : i64, scratch_operands = 0 : i64, tpu.core_type = #tpu.core_type<tc>, window_params = [{transform_indices = @transform_0, window_bounds = array<i64: 4, 2048>}, {transform_indices = @transform_1, window_bounds = array<i64: 1, 8, 4>}, {transform_indices = @transform_2, window_bounds = array<i64: 1, 8, 8>}, {transform_indices = @transform_3, window_bounds = array<i64: 1, 4, 8>}, {transform_indices = @transform_4, window_bounds = array<i64: 1, 4, 2048>}]} {
    %c0 = arith.constant 0 : index
    %c0_0 = arith.constant 0 : index
    %0 = vector.load %arg2[%c0, %c0_0] : memref<4x2048xf32, #tpu.memory_space<vmem>>, vector<4x2048xf32>
    %c0_1 = arith.constant 0 : index
    %c0_2 = arith.constant 0 : index
    %c0_3 = arith.constant 0 : index
    %1 = vector.load %arg3[%c0_1, %c0_2, %c0_3] : memref<1x8x4xf32, #tpu.memory_space<vmem>>, vector<1x8x4xf32>
    %2 = vector.shape_cast %1 : vector<1x8x4xf32> to vector<8x4xf32>
    %c0_4 = arith.constant 0 : index
    %c0_5 = arith.constant 0 : index
    %c0_6 = arith.constant 0 : index
    %3 = vector.load %arg4[%c0_4, %c0_5, %c0_6] : memref<1x8x8xf32, #tpu.memory_space<vmem>>, vector<1x8x8xf32>
    %4 = vector.shape_cast %3 : vector<1x8x8xf32> to vector<8x8xf32>
    %c0_7 = arith.constant 0 : index
    %c0_8 = arith.constant 0 : index
    %c0_9 = arith.constant 0 : index
    %5 = vector.load %arg5[%c0_7, %c0_8, %c0_9] : memref<1x4x8xf32, #tpu.memory_space<vmem>>, vector<1x4x8xf32>
    %6 = vector.shape_cast %5 : vector<1x4x8xf32> to vector<4x8xf32>
    %cst = arith.constant dense<0.000000e+00> : vector<8x2048xf32>
    %7 = tpu.matmul %2, %0, %cst {dimension_numbers = #tpu.dot_dimension_numbers<[1], [0], [0], [1], [0, 0, 1, 1], [], []>, precision = #tpu.contract_precision<fp32>} : vector<8x4xf32>, vector<4x2048xf32>, vector<8x2048xf32> -> vector<8x2048xf32>
    %8 = vector.extract_strided_slice %4 {offsets = [0, 0], sizes = [8, 1], strides = [1, 1]} : vector<8x8xf32> to vector<8x1xf32>
    %9 = vector.broadcast %8 : vector<8x1xf32> to vector<8x2048xf32>
    %10 = arith.addf %7, %9 : vector<8x2048xf32>
    %cst_10 = arith.constant 0.000000e+00 : f32
    %11 = vector.broadcast %cst_10 : f32 to vector<8x2048xf32>
    %12 = arith.maximumf %10, %11 : vector<8x2048xf32>
    %13 = vector.extract_strided_slice %4 {offsets = [0, 1], sizes = [8, 1], strides = [1, 1]} : vector<8x8xf32> to vector<8x1xf32>
    %14 = vector.broadcast %13 : vector<8x1xf32> to vector<8x2048xf32>
    %15 = arith.mulf %14, %12 : vector<8x2048xf32>
    %16 = math.exp %15 : vector<8x2048xf32>
    %17 = math.sqrt %12 : vector<8x2048xf32>
    %18 = vector.extract_strided_slice %4 {offsets = [0, 2], sizes = [8, 1], strides = [1, 1]} : vector<8x8xf32> to vector<8x1xf32>
    %19 = vector.broadcast %18 : vector<8x1xf32> to vector<8x2048xf32>
    %20 = arith.mulf %17, %19 : vector<8x2048xf32>
    %cst_11 = arith.constant 0.541341126 : f32
    %21 = vector.broadcast %cst_11 : f32 to vector<8x2048xf32>
    %22 = arith.mulf %21, %20 : vector<8x2048xf32>
    %cst_12 = arith.constant -1.62402344 : f32
    %23 = vector.broadcast %cst_12 : f32 to vector<8x2048xf32>
    %24 = arith.addf %22, %23 : vector<8x2048xf32>
    %25 = arith.mulf %24, %20 : vector<8x2048xf32>
    %cst_13 = arith.constant 1.21801758 : f32
    %26 = vector.broadcast %cst_13 : f32 to vector<8x2048xf32>
    %27 = arith.addf %25, %26 : vector<8x2048xf32>
    %28 = vector.extract_strided_slice %4 {offsets = [0, 3], sizes = [8, 1], strides = [1, 1]} : vector<8x8xf32> to vector<8x1xf32>
    %29 = vector.broadcast %28 : vector<8x1xf32> to vector<8x2048xf32>
    %30 = arith.cmpf ole, %12, %29 : vector<8x2048xf32>
    %31 = vector.extract_strided_slice %4 {offsets = [0, 4], sizes = [8, 1], strides = [1, 1]} : vector<8x8xf32> to vector<8x1xf32>
    %32 = vector.broadcast %31 : vector<8x1xf32> to vector<8x2048xf32>
    %33 = arith.cmpf olt, %12, %32 : vector<8x2048xf32>
    %cst_14 = arith.constant 0.000000e+00 : f32
    %34 = vector.broadcast %cst_14 : f32 to vector<8x2048xf32>
    %35 = arith.select %33, %27, %34 : vector<8x2048xi1>, vector<8x2048xf32>
    %36 = arith.select %30, %16, %35 : vector<8x2048xi1>, vector<8x2048xf32>
    %cst_15 = arith.constant dense<0.000000e+00> : vector<4x2048xf32>
    %37 = tpu.matmul %6, %36, %cst_15 {dimension_numbers = #tpu.dot_dimension_numbers<[1], [0], [0], [1], [0, 0, 1, 1], [], []>} : vector<4x8xf32>, vector<8x2048xf32>, vector<4x2048xf32> -> vector<4x2048xf32>
    %c0_16 = arith.constant 0 : index
    %c0_17 = arith.constant 0 : index
    %c0_18 = arith.constant 0 : index
    %38 = vector.load %arg6[%c0_16, %c0_17, %c0_18] : memref<1x4x2048xf32, #tpu.memory_space<vmem>>, vector<1x4x2048xf32>
    %39 = vector.shape_cast %38 : vector<1x4x2048xf32> to vector<4x2048xf32>
    %40 = vector.shape_cast %37 : vector<4x2048xf32> to vector<1x4x2048xf32>
    tpu.vector_store %arg6[%c0_16, %c0_17, %c0_18], %40 {strides = array<i32>} : memref<1x4x2048xf32, #tpu.memory_space<vmem>>, vector<1x4x2048xf32>,
    return
  }
  func.func @transform_0(%arg0: i32, %arg1: i32) -> (i32, i32) {
    %c0_i32 = arith.constant 0 : i32
    %c0_i32_0 = arith.constant 0 : i32
    return %c0_i32, %arg1 : i32, i32
  }
  func.func @transform_1(%arg0: i32, %arg1: i32) -> (i32, i32, i32) {
    %c0_i32 = arith.constant 0 : i32
    %c0_i32_0 = arith.constant 0 : i32
    %c0_i32_1 = arith.constant 0 : i32
    return %arg0, %c0_i32, %c0_i32_0 : i32, i32, i32
  }
  func.func @transform_2(%arg0: i32, %arg1: i32) -> (i32, i32, i32) {
    %c0_i32 = arith.constant 0 : i32
    %c0_i32_0 = arith.constant 0 : i32
    %c0_i32_1 = arith.constant 0 : i32
    return %arg0, %c0_i32, %c0_i32_0 : i32, i32, i32
  }
  func.func @transform_3(%arg0: i32, %arg1: i32) -> (i32, i32, i32) {
    %c0_i32 = arith.constant 0 : i32
    %c0_i32_0 = arith.constant 0 : i32
    %c0_i32_1 = arith.constant 0 : i32
    return %arg0, %c0_i32, %c0_i32_0 : i32, i32, i32
  }
  func.func @transform_4(%arg0: i32, %arg1: i32) -> (i32, i32, i32) {
    %c0_i32 = arith.constant 0 : i32
    %c0_i32_0 = arith.constant 0 : i32
    return %arg0, %c0_i32, %arg1 : i32, i32, i32
  }
}

</mosaic_0001>

<bundles_post_ra>
// kernel: tpu_custom_call.1
= control target key start
LH: loop header
LB: loop body
LE: loop exit
PB: predicated region body
PF: predicated region fallthrough
CT: control target
= control target key end

     0   :  { %9 = vsyncpa [#allocation3], 0  ;;  %s6460_s0 = inlined_call_operand.hbm [shape: f32[4,4096], index: 0, kind: input, shape index: {}]   ;;  %s6461_s1 = inlined_call_operand.vmem [shape: f32[2,8,4], index: 1, kind: input, shape index: {}]   ;;  %s6462_s2 = inlined_call_operand.vmem [shape: f32[2,8,8], index: 2, kind: input, shape index: {}]   ;;  %s6463_s3 = inlined_call_operand.vmem [shape: f32[2,4,8], index: 3, kind: input, shape index: {}]   ;;  %s6464_s4 = inlined_call_operand.hbm [shape: f32[2,4,4096], index: 4, kind: output, shape index: {}]  }
   0x1   :  { %11 = vsyncpa [#allocation3 + $0x1], 0 }
   0x2   :  { %12 = vsyncpa [#allocation4], 0 }
   0x3   :  { %14 = vsyncpa [#allocation4 + $0x1], 0  ;;  %s5652_s15 = smov 0   ;;  %s5654_s16 = smov 0  }
   0x4   :  { %s5656_s17 = smov 0   ;;  %s5658_s18 = smov 0  }
   0x5   :  { %s5660_s19 = smov 0   ;;  %s5662_s20 = smov 0  }
   0x6   :  { %s5664_s21 = smov 0   ;;  %s5666_s22 = smov 0  }
   0x7   :  { %s5668_s23 = smov 0   ;;  %s5670_s24 = smov 0  }
   0x8   :  { %s5672_s25 = smov 0  }
   0x9 LB: > { %s5155_s26 = sadd.s32 4294967295, %s5617_s25   ;;  %s5156_s27 = sadd.s32 4294967294, %s5617_s25   ;;  %s5617_s25 = sphi %s5672_s25, %s20_s25   ;;  %s5613_s24 = sphi %s5670_s24, %s6490_s24   ;;  %s5609_s23 = sphi %s5668_s23, %s6489_s23   ;;  %s5605_s22 = sphi %s5666_s22, %s6488_s22   ;;  %s5601_s21 = sphi %s5664_s21, %s6487_s21   ;;  %s5597_s20 = sphi %s5662_s20, %s6486_s20   ;;  %s5593_s19 = sphi %s5660_s19, %s6485_s19   ;;  %s5589_s18 = sphi %s5658_s18, %s6484_s18   ;;  %s5585_s17 = sphi %s5656_s17, %s6483_s17   ;;  %s5581_s16 = sphi %s5654_s16, %s6482_s16   ;;  %s5577_s15 = sphi %s5652_s15, %s6481_s15  }
   0xa   : > { %s29_s28 = sadd.s32 1, %s5609_s23  ;;  %s32_s29 = sadd.s32 1, %s5613_s24 }
   0xb   : > { %p30_p0 = scmp.ge.s32.totalorder %s29_s28, 2  ;;  %s39_s30 = sadd.s32 1, %s5597_s20 }
   0xc   : > { %p46_p1 = scmp.ne.s32.totalorder %s5597_s20, %s5593_s19  ;;  %p47_p2 = scmp.eq.s32.totalorder %s5617_s25, 0 }
   0xd   : > { %s6492_s28 = smov (%p30_p0, %s29_s28), 0  ;;  %s6494_s29 = smov (!%p30_p0, %s32_s29), %s5613_s24 }
   0xe   : > { %6468 = sst [smem:[#allocation8_spill]] %s6492_s28  ;;  %s36_s5 = ssub.s32 %s5609_s23, %s6492_s28 }
   0xf   : > { %p5718_p3 = por %p47_p2, %p46_p1  ;;  %p34_p4 = scmp.ge.s32.totalorder %s6494_s29, 2 }
  0x10   : > { %p37_p5 = scmp.eq.s32.totalorder %s36_s5, 0  ;;  %p52_p6 = scmp.ne.s32.totalorder %s5593_s19, %s5589_s18 }
  0x11   : > { %p53_p7 = scmp.eq.s32.totalorder %s5155_s26, 0  ;;  %s6496_s29 = smov (%p34_p4, %s6494_s29), 0 }
  0x12   : > { %6470 = sst [smem:[#allocation9_spill]] %s6496_s29  ;;  %s140_s9 = ssub.s32 %s5613_s24, %s6496_s29 }
  0x13   : > { %s5726_s7 = scalar_select %p37_p5, %s5597_s20, %s39_s30  }
  0x14   : > { %p5728_p8 = por %p53_p7, %p52_p6  ;;  %s142_s10 = sor.u32 %s140_s9, %s36_s5 }
  0x15   : > { %s145_s11 = sadd.s32 1, %s5585_s17  ;;  %p143_p9 = scmp.eq.s32.totalorder %s142_s10, 0 }
  0x16   : > { %p155_p10 = scmp.ne.s32.totalorder %s5585_s17, %s5581_s16  ;;  %p156_p11 = scmp.eq.s32.totalorder %s5155_s26, 3 }
  0x17   : > { %p161_p12 = scmp.ne.s32.totalorder %s5581_s16, %s5577_s15  ;;  %p162_p0 = scmp.eq.s32.totalorder %s5156_s27, 3 }
  0x18   : > { %s5740_s12 = scalar_select %p143_p9, %s5585_s17, %s145_s11  }
  0x19   : > { %p5742_p13 = por %p156_p11, %p155_p10  ;;  %p5291_p1 = scmp.lt.s32.totalorder %s5617_s25, 4 }
  0x1a   : > { %p5747_p2 = por %p162_p0, %p161_p12  ;;  %s182_s18 = sand.u32 1, %s5597_s20  }
  0x1b   : > { %s6472_s13 = scalar_select %p5742_p13, 1, 0 }
  0x1c   : > { %s6473_s14 = scalar_select %p5747_p2, 1, 0 }
  0x1d   : > { %s5159_s30 = sshll.u32 %s182_s18, 6  ;;  %s5182_s5 = sshll.u32 %s5609_s23, 10 }
  0x1e   : > { %s5756_s26 = scalar_lea.hbm %s6460_s0, %s5182_s5  ;;  %s186_s11 = scalar_lea.vmem [#allocation2], %s5159_s30 }
  0x1f   : > { %s194_s29 = sshll.u32 %s186_s11, 4  ;;  %p5762_p4 = pnand %p5291_p1, %p5718_p3  ;;  %s5758_s29 = int_to_ptr.vmem [resolvable:$true] %s194_s29 }
  0x20   : > { %s183_s9 = scalar_lea.sflag [#allocation3], %s182_s18  ;;  %s5465_s5 = scalar_lea.hbm %s5756_s26, 1024 }
  0x21   : > { %p5466_p7 = scmp.ne.s32.totalorder %s5756_s26, %s5465_s5  ;;  %p5467_p9 = pneg %p5762_p4 }
  0x22   : > { %s5470_s6 = scalar_lea.hbm %s6460_s0, 2048  ;;  %p5471_p3 = scmp.lt.u32.totalorder %s5756_s26, %s6460_s0 }
  0x23   : > { %p5468_p10 = pnand %p5467_p9, %p5466_p7  ;;  %p5472_p12 = scmp.lt.u32.totalorder %s5470_s6, %s5465_s5 }
  0x24   : > { %p5474_p1 = scmp.lt.u32.totalorder %s5465_s5, %s5756_s26 }
  0x25   : > { %p5469_p11 = pneg %p5468_p10  ;;  %p5473_p0 = por %p5472_p12, %p5471_p3 }
  0x27   : > { %p5475_p5 = por %p5474_p1, %p5473_p0 }
  0x29   : > { %p5476_p6 = pnand %p5475_p5, %p5469_p11 }
  0x2b   : > { %5479 = shalt.err (!%p5476_p6)
}
  0x2c   : > { %s5480_s18 = scalar_lea.vmem %s5758_s29, 1024  ;;  %s5619_s30 = smov [#allocation2]  }
  0x2d   : > { %p5481_p7 = scmp.ne.s32.totalorder %s5758_s29, %s5480_s18  ;;  %s5485_s10 = sshll.u32 %s5619_s30, 4  ;;  %s5486_s10 = int_to_ptr.vmem [resolvable:$false] %s5485_s10 }
  0x2e   : > { %s5487_s28 = scalar_lea.vmem %s5486_s10, 2048  ;;  %p5488_p13 = scmp.lt.s32.totalorder %s5758_s29, %s5486_s10 }
  0x2f   : > { %p5483_p10 = pnand %p5481_p7, %p5467_p9  ;;  %p5489_p3 = scmp.lt.s32.totalorder %s5487_s28, %s5480_s18 }
  0x31   : > { %p5484_p2 = pneg %p5483_p10  ;;  %p5490_p12 = por %p5489_p3, %p5488_p13 }
  0x33   : > { %p5491_p0 = pnand %p5490_p12, %p5484_p2 }
  0x35   : > { %5494 = shalt.err (!%p5491_p0)
}
  0x36   : > { %5286 = dma.hbm_to_vmem [thread:$0]  (!%p5762_p4), %s5756_s26, 1024, %s5758_s29, %s183_s9  }
  0x37   : > { %p6475_p5 = scmp.lt.s32.totalorder %s5617_s25, 5  ;;  %p6476_p6 = scmp.ge.s32.totalorder %s5617_s25, 1 }
  0x39   : > { %p221_p9 = pnand %p6476_p6, %p6475_p5 }
  0x3a   : > { %s226_s5 = sand.u32 (!%p221_p9), 1, %s5593_s19  }
  0x3b   : > { %224 = sbr.rel (%p221_p9) target bundleno = 733 (0x2dd), region = 36  ;;  %s5163_s6 = sshll.u32 (!%p221_p9), %s226_s5, 6 }
  0x3c   : > { %s227_s11 = scalar_lea.sflag (!%p221_p9), [#allocation3], %s226_s5  ;;  %s5798_s18 = scalar_lea.vmem (!%p221_p9), [#allocation2], %s5163_s6 }
  0x42   : > { %5568 = dma.done.wait (%p5728_p8), %s227_s11, 1024  }
  0x43   : > { %5570 = vsyncadd (%p5728_p8), %s227_s11, 4294966272  ;;  %p268_p13 = scmp.lt.s32.totalorder %s5605_s22, 1  ;;  %v5620_v0 = vmov 0.0   ;;  %vm317_vm0 = vcmask 1043456   ;;  %vm313_vm1 = vcmask 31744   ;;  %v5621_v1 = vmov 2  }
  0x44   : > { %416 = vmatprep.mubr.f32.mxu0 %v5620_v0  ;;  %881 = vmatprep.mubr.f32.mxu1 %v5620_v0  ;;  %v281_v2 = vld [vmem:[%s5798_s18] sm:$0xff]  ;;  %v282_v3 = vld [vmem:[%s5798_s18 + $0x8] sm:$0xff]  ;;  %v5622_v38 = vmov 0   ;;  %v5623_v39 = vmov 4   ;;  %v5624_v40 = vmov 3   ;;  %v5625_v41 = vmov 1  }
  0x45   : > { %s5808_s29 = scalar_select %p268_p13, %s5605_s22, 1  ;;  %5389 = vset.pattern.permute.xlu1 %v5621_v1  ;;  %v305_v5 = vcombine.high %v281_v2, %v281_v2  ;;  %v306_v6 = vcombine.high %v282_v3, %v282_v3  ;;  %v318_v7 = vsel %vm317_vm0, %v281_v2, 0  ;;  %v322_v8 = vsel %vm317_vm0, %v282_v3, 0  ;;  %5387 = vset.pattern.permute.xlu0 %v5622_v38  ;;  %v283_v42 = vld [vmem:[%s5798_s18 + $0x10] sm:$0xff]  ;;  %v284_v43 = vld [vmem:[%s5798_s18 + $0x18] sm:$0xff] }
  0x46   : > { %v5821_v9 = vand.u32 4294901760, %v318_v7  ;;  %v5823_v10 = vand.u32 4294901760, %v322_v8  ;;  %v307_v44 = vcombine.high %v283_v42, %v283_v42  ;;  %v308_v45 = vcombine.high %v284_v43, %v284_v43  ;;  %s5177_s9 = sshll.u32 %s5601_s21, 4  ;;  %p6477_p2 = scmp.ne.s32.totalorder %s6472_s13, 0 }
  0x47   : > { %s5165_s26 = sshll.u32 %s5808_s29, 3  ;;  %v320_v13 = vsel %vm317_vm0, %v305_v5, 0  ;;  %v324_v14 = vsel %vm317_vm0, %v306_v6, 0  ;;  %v326_v48 = vsel %vm317_vm0, %v283_v42, 0  ;;  %v330_v49 = vsel %vm317_vm0, %v284_v43, 0  ;;  %s5167_s5 = sshll.u32 %s5808_s29, 2 }
  0x48   : > { %s271_s8 = scalar_lea.vmem %s6461_s1, %s5165_s26  ;;  %s275_s28 = scalar_lea.vmem %s6462_s2, %s5165_s26  ;;  %v5829_v16 = vand.u32 4294901760, %v320_v13  ;;  %v5831_v17 = vand.u32 4294901760, %v324_v14  ;;  %v5834_v18 = vsub.f32 %v318_v7, %v5821_v9  ;;  %v5837_v19 = vsub.f32 %v322_v8, %v5823_v10  ;;  %v285_v7 = vld [vmem:[%s5798_s18 + $0x20] sm:$0xff]  ;;  %v286_v8 = vld [vmem:[%s5798_s18 + $0x28] sm:$0xff] }
  0x49   : > { %v289_v4 = vld [vmem:[%s271_s8] sm:$0xff]  ;;  %v328_v46 = vsel %vm317_vm0, %v307_v44, 0  ;;  %v332_v47 = vsel %vm317_vm0, %v308_v45, 0  ;;  %v5897_v52 = vand.u32 4294901760, %v326_v48  ;;  %v5899_v53 = vand.u32 4294901760, %v330_v49  ;;  %s264_s29 = sand.u32 1, %s5581_s16  }
  0x4a   : > { %v315_v11 = vsel %vm313_vm1, %v289_v4, 0  ;;  %v290_v12 = vld [vmem:[%s275_s28] sm:$0xff]  ;;  %351 = vmatprep.subr.mxu0 %v5829_v16  ;;  %816 = vmatprep.subr.mxu1 %v5831_v17  ;;  %v429_v21 = vsub.f32 %v320_v13, %v5829_v16  ;;  %v894_v22 = vsub.f32 %v324_v14, %v5831_v17  ;;  %v436_v23 = vand.u32 4294901760, %v5834_v18  ;;  %s5164_s26 = sshll.u32 %s264_s29, 6  ;;  %s5178_s8 = sshll.u32 %s5605_s22, 5 }
  0x4b   : > { %v5827_v15 = vand.u32 4294901760, %v315_v11  ;;  %4251 = vperm.xlu1 %5389, %v290_v12   ;;  %v901_v24 = vand.u32 4294901760, %v5837_v19  ;;  %353 = vmatpush1.msra.mxu0 %v5821_v9  ;;  %v5887_v50 = vand.u32 4294901760, %v328_v46  ;;  %v5889_v51 = vand.u32 4294901760, %v332_v47  ;;  %s6380_s27 = scalar_lea.vmem [#allocation5], %s5164_s26  ;;  %s5031_s30 = sadd.s32 %s5178_s8, %s5177_s9 }
  0x4c   : > { %818 = vmatpush1.msra.mxu1 %v5823_v10  ;;  %v430_v26 = vand.u32 4294901760, %v429_v21  ;;  %v895_v27 = vand.u32 4294901760, %v894_v22  ;;  %v437_v28 = vsub.f32 %v5834_v18, %v436_v23  ;;  %294 = vperm.xlu0 %5387, %v290_v12   ;;  %v5908_v56 = vsub.f32 %v326_v48, %v5897_v52  ;;  %s5179_s10 = sshll.u32 %s5031_s30, 6  ;;  %s5035_s28 = sshll.u32 %s6380_s27, 4  ;;  %s6397_s28 = int_to_ptr.vmem [resolvable:$true] %s5035_s28 }
  0x4d   : > { %v5840_v20 = vsub.f32 %v315_v11, %v5827_v15  ;;  %v902_v29 = vsub.f32 %v5837_v19, %v901_v24  ;;  %v1359_v54 = vsub.f32 %v328_v46, %v5887_v50  ;;  %v1824_v55 = vsub.f32 %v332_v47, %v5889_v51  ;;  %s6395_s11 = scalar_lea.hbm %s6464_s4, %s5179_s10  ;;  %s5019_s21 = scalar_lea.sflag [#allocation4], %s264_s29 }
  0x4e   : > { %v431_v31 = vsub.f32 %v429_v21, %v430_v26  ;;  %v896_v32 = vsub.f32 %v894_v22, %v895_v27  ;;  %v438_v34 = vand.u32 4294901760, %v437_v28  ;;  %v5911_v57 = vsub.f32 %v330_v49, %v5899_v53  ;;  %s5495_s22 = scalar_lea.vmem %s6397_s28, 1024 }
  0x4f   : > { %v5851_v25 = vand.u32 4294901760, %v5840_v20  ;;  %v903_v35 = vand.u32 4294901760, %v902_v29  ;;  %5390 = vset.pattern.permute.xlu1 %v5623_v39  ;;  %v1360_v58 = vand.u32 4294901760, %v1359_v54  ;;  %v1825_v59 = vand.u32 4294901760, %v1824_v55  ;;  %p5496_p8 = scmp.ne.s32.totalorder %s6397_s28, %s5495_s22 }
  0x50   : > { %v432_v36 = vand.u32 4294901760, %v431_v31  ;;  %v897_v37 = vand.u32 4294901760, %v896_v32  ;;  %4355 = vperm.xlu1 %5390, %v290_v12   ;;  %5388 = vset.pattern.permute.xlu0 %v5625_v41  ;;  %v1366_v60 = vand.u32 4294901760, %v5908_v56  ;;  %v1831_v61 = vand.u32 4294901760, %v5911_v57 }
  0x51   : > { %v420_v30 = vsub.f32 %v5840_v20, %v5851_v25  ;;  %4087 = vperm.xlu0 %5388, %v290_v12   ;;  %v1361_v62 = vsub.f32 %v1359_v54, %v1360_v58  ;;  %v1826_v63 = vsub.f32 %v1824_v55, %v1825_v59  ;;  %v334_v13 = vsel %vm317_vm0, %v285_v7, 0  ;;  %p5497_p4 = pnand %p5496_p8, %p6477_p2 }
  0x52   : > { %433 = vmatprep.subr.mxu0 %v432_v36  ;;  %898 = vmatprep.subr.mxu1 %v897_v37  ;;  %v1367_v1 = vsub.f32 %v5908_v56, %v1366_v60  ;;  %v1832_v2 = vsub.f32 %v5911_v57, %v1831_v61  ;;  %v338_v14 = vsel %vm317_vm0, %v286_v8, 0  ;;  %vm4406_vm13 = vcmask 64512  }
  0x53   : > { %v5861_v33 = vand.u32 4294901760, %v420_v30  ;;  %v1362_v3 = vand.u32 4294901760, %v1361_v62  ;;  %v1827_v4 = vand.u32 4294901760, %v1826_v63  ;;  %p5498_p11 = pneg %p5497_p4 }
  0x54   : > { %5391 = vset.pattern.permute.xlu1 %v5624_v40  ;;  %v1368_v5 = vand.u32 4294901760, %v1367_v1  ;;  %v1833_v6 = vand.u32 4294901760, %v1832_v2  ;;  %v288_v40 = vld [vmem:[%s5798_s18 + $0x38] sm:$0xff] }
  0x55   : > { %422 = vmatmul.mubr.f32.vlgmr.msra.gmra.mrb[0].mxu0 %v5861_v33  ;;  %887 = vmatmul.mubr.f32.vlgmr.msra.gmra.mrb[0].mxu1 %v5861_v33  ;;  %v312_v42 = vcombine.high %v288_v40, %v288_v40  ;;  %v346_v46 = vsel %vm317_vm0, %v288_v40, 0 }
  0x56   : > { %439 = vmatpush1.msra.mxu0 %v438_v34  ;;  %904 = vmatpush1.msra.mxu1 %v903_v35 }
  0x57   : > { %502 = vmatprep.mubr.f32.mxu0 %v5620_v0  ;;  %967 = vmatprep.mubr.f32.mxu1 %v5620_v0  ;;  %v348_v44 = vsel %vm317_vm0, %v312_v42, 0 }
  0x58   : > { %512 = vmatprep.subr.mxu0 %v429_v21  ;;  %977 = vmatprep.subr.mxu1 %v894_v22  ;;  %v6021_v48 = vand.u32 4294901760, %v348_v44 }
  0x59   : > { %4335 = vperm.xlu1 %5391, %v290_v12   ;;  %5392 = vset.pattern.permute.xlu0 %v5623_v39  ;;  %v287_v39 = vld [vmem:[%s5798_s18 + $0x30] sm:$0xff]  ;;  %s279_s18 = scalar_lea.vmem %s6463_s3, %s5167_s5 }
  0x5a   : > { %v311_v41 = vcombine.high %v287_v39, %v287_v39  ;;  %v342_v45 = vsel %vm317_vm0, %v287_v39, 0 }
  0x5b   : > { %v6025_v49 = vand.u32 4294901760, %v342_v45 }
  0x5c   : > { %v344_v43 = vsel %vm317_vm0, %v311_v41, 0 }
  0x5d   : > { %504 = vmatmul.mubr.f32.vlgmr.msra.gmra.mrb[0].mxu0 %v5827_v15  ;;  %969 = vmatmul.mubr.f32.vlgmr.msra.gmra.mrb[0].mxu1 %v5827_v15  ;;  %v6019_v47 = vand.u32 4294901760, %v344_v43 }
  0x5e   : > { %515 = vmatpush1.msra.mxu0 %v5834_v18  ;;  %980 = vmatpush1.msra.mxu1 %v5837_v19  ;;  %v5961_v18 = vand.u32 4294901760, %v334_v13  ;;  %v5963_v19 = vand.u32 4294901760, %v338_v14 }
  0x5f   : > { %578 = vmatprep.mubr.f32.mxu0 %v5620_v0  ;;  %1043 = vmatprep.mubr.f32.mxu1 %v5620_v0 }
  0x60   : > { %588 = vmatprep.subr.mxu0 %v5829_v16  ;;  %1053 = vmatprep.subr.mxu1 %v5831_v17 }
  0x65   : > { %581 = vmatmul.mubr.f32.vlgmr.msra.gmra.mrb[0].mxu0 %v5840_v20  ;;  %1046 = vmatmul.mubr.f32.vlgmr.msra.gmra.mrb[0].mxu1 %v5840_v20 }
  0x66   : > { %590 = vmatpush1.msra.mxu0 %v5821_v9  ;;  %1055 = vmatpush1.msra.mxu1 %v5823_v10 }
  0x67   : > { %653 = vmatprep.mubr.f32.mxu0 %v5620_v0  ;;  %1118 = vmatprep.mubr.f32.mxu1 %v5620_v0 }
  0x68   : > { %666 = vmatprep.subr.mxu0 %v430_v26  ;;  %1131 = vmatprep.subr.mxu1 %v895_v27 }
  0x6d   : > { %657 = vmatmul.mubr.f32.vlgmr.msra.gmra.mrb[0].mxu0 %v5851_v25  ;;  %1122 = vmatmul.mubr.f32.vlgmr.msra.gmra.mrb[0].mxu1 %v5851_v25 }
  0x6e   : > { %670 = vmatpush1.msra.mxu0 %v436_v23  ;;  %1135 = vmatpush1.msra.mxu1 %v901_v24  ;;  %v5972_v23 = vsub.f32 %v334_v13, %v5961_v18  ;;  %v5975_v24 = vsub.f32 %v338_v14, %v5963_v19 }
  0x6f   : > { %733 = vmatprep.mubr.f32.mxu0 %v5620_v0  ;;  %1198 = vmatprep.mubr.f32.mxu1 %v5620_v0 }
  0x70   : > { %742 = vmatprep.subr.mxu0 %v5829_v16  ;;  %1207 = vmatprep.subr.mxu1 %v5831_v17  ;;  %v2296_v28 = vand.u32 4294901760, %v5972_v23  ;;  %v2761_v29 = vand.u32 4294901760, %v5975_v24 }
  0x72   : > { %v2297_v32 = vsub.f32 %v5972_v23, %v2296_v28  ;;  %v2762_v34 = vsub.f32 %v5975_v24, %v2761_v29 }
  0x74   : > { %v2298_v37 = vand.u32 4294901760, %v2297_v32  ;;  %v2763_v38 = vand.u32 4294901760, %v2762_v34 }
  0x75   : > { %735 = vmatmul.mubr.f32.vlgmr.msra.gmra.mrb[0].mxu0 %v5827_v15  ;;  %1200 = vmatmul.mubr.f32.vlgmr.msra.gmra.mrb[0].mxu1 %v5827_v15 }
  0x76   : > { %744 = vmatpush1.msra.mxu0 %v5821_v9  ;;  %1209 = vmatpush1.msra.mxu1 %v5823_v10  ;;  %v309_v9 = vcombine.high %v285_v7, %v285_v7  ;;  %v310_v10 = vcombine.high %v286_v8, %v286_v8 }
  0x77   : > { %807 = vmatprep.mubr.f32.mxu0 %v5620_v0  ;;  %1272 = vmatprep.mubr.f32.mxu1 %v5620_v0 }
  0x78   : > { %1281 = vmatprep.subr.mxu0 %v5887_v50  ;;  %1746 = vmatprep.subr.mxu1 %v5889_v51  ;;  %v336_v11 = vsel %vm317_vm0, %v309_v9, 0  ;;  %v340_v12 = vsel %vm317_vm0, %v310_v10, 0 }
  0x79   : > { %v5955_v16 = vand.u32 4294901760, %v336_v11  ;;  %v5957_v17 = vand.u32 4294901760, %v340_v12 }
  0x7b   : > { %v2289_v21 = vsub.f32 %v336_v11, %v5955_v16  ;;  %v2754_v22 = vsub.f32 %v340_v12, %v5957_v17 }
  0x7d   : > { %809 = vmatmul.mubr.f32.vlgmr.msra.gmra.mrb[0].mxu0 %v5827_v15  ;;  %1274 = vmatmul.mubr.f32.vlgmr.msra.gmra.mrb[0].mxu1 %v5827_v15  ;;  %v2290_v26 = vand.u32 4294901760, %v2289_v21  ;;  %v2755_v27 = vand.u32 4294901760, %v2754_v22 }
  0x7e   : > { %1283 = vmatpush1.msra.mxu0 %v5897_v52  ;;  %1346 = vmatprep.mubr.f32.mxu0 %v5620_v0 }
  0x7f   : > { %1748 = vmatpush1.msra.mxu1 %v5899_v53  ;;  %1811 = vmatprep.mubr.f32.mxu1 %v5620_v0  ;;  %v2291_v30 = vsub.f32 %v2289_v21, %v2290_v26  ;;  %v2756_v31 = vsub.f32 %v2754_v22, %v2755_v27 }
  0x80   : > { %1363 = vmatprep.subr.mxu0 %v1362_v3  ;;  %1828 = vmatprep.subr.mxu1 %v1827_v4 }
  0x81   : > { %1352 = vmatmul.mubr.f32.vlgmr.msra.gmra.mrb[2].mxu0 %v5861_v33  ;;  %1817 = vmatmul.mubr.f32.vlgmr.msra.gmra.mrb[2].mxu1 %v5861_v33  ;;  %v2292_v35 = vand.u32 4294901760, %v2291_v30  ;;  %v2757_v36 = vand.u32 4294901760, %v2756_v31 }
  0x82   : > { %1369 = vmatpush1.msra.mxu0 %v1368_v5  ;;  %1834 = vmatpush1.msra.mxu1 %v1833_v6 }
  0x83   : > { %1432 = vmatprep.mubr.f32.mxu0 %v5620_v0  ;;  %1897 = vmatprep.mubr.f32.mxu1 %v5620_v0 }
  0x84   : > { %1442 = vmatprep.subr.mxu0 %v1359_v54  ;;  %1907 = vmatprep.subr.mxu1 %v1824_v55 }
  0x89   : > { %1434 = vmatmul.mubr.f32.vlgmr.msra.gmra.mrb[2].mxu0 %v5827_v15  ;;  %1899 = vmatmul.mubr.f32.vlgmr.msra.gmra.mrb[2].mxu1 %v5827_v15 }
  0x8a   : > { %1445 = vmatpush1.msra.mxu0 %v5908_v56  ;;  %1910 = vmatpush1.msra.mxu1 %v5911_v57 }
  0x8b   : > { %1508 = vmatprep.mubr.f32.mxu0 %v5620_v0  ;;  %1973 = vmatprep.mubr.f32.mxu1 %v5620_v0 }
  0x8c   : > { %1518 = vmatprep.subr.mxu0 %v5887_v50  ;;  %1983 = vmatprep.subr.mxu1 %v5889_v51 }
  0x91   : > { %1511 = vmatmul.mubr.f32.vlgmr.msra.gmra.mrb[2].mxu0 %v5840_v20  ;;  %1976 = vmatmul.mubr.f32.vlgmr.msra.gmra.mrb[2].mxu1 %v5840_v20 }
  0x92   : > { %1520 = vmatpush1.msra.mxu0 %v5897_v52  ;;  %1985 = vmatpush1.msra.mxu1 %v5899_v53 }
  0x93   : > { %1583 = vmatprep.mubr.f32.mxu0 %v5620_v0  ;;  %2048 = vmatprep.mubr.f32.mxu1 %v5620_v0 }
  0x94   : > { %1596 = vmatprep.subr.mxu0 %v1360_v58  ;;  %2061 = vmatprep.subr.mxu1 %v1825_v59 }
  0x99   : > { %1587 = vmatmul.mubr.f32.vlgmr.msra.gmra.mrb[2].mxu0 %v5851_v25  ;;  %2052 = vmatmul.mubr.f32.vlgmr.msra.gmra.mrb[2].mxu1 %v5851_v25 }
  0x9a   : > { %1600 = vmatpush1.msra.mxu0 %v1366_v60  ;;  %2065 = vmatpush1.msra.mxu1 %v1831_v61 }
  0x9b   : > { %1663 = vmatprep.mubr.f32.mxu0 %v5620_v0  ;;  %2128 = vmatprep.mubr.f32.mxu1 %v5620_v0 }
  0x9c   : > { %1672 = vmatprep.subr.mxu0 %v5887_v50  ;;  %2137 = vmatprep.subr.mxu1 %v5889_v51  ;;  %v6027_v50 = vand.u32 4294901760, %v346_v46  ;;  %v3219_v51 = vsub.f32 %v344_v43, %v6019_v47 }
  0x9e   : > { %v3690_v54 = vsub.f32 %v346_v46, %v6027_v50  ;;  %v3220_v55 = vand.u32 4294901760, %v3219_v51 }
  0xa0   : > { %v3691_v58 = vand.u32 4294901760, %v3690_v54  ;;  %v3221_v59 = vsub.f32 %v3219_v51, %v3220_v55 }
  0xa1   : > { %1665 = vmatmul.mubr.f32.vlgmr.msra.gmra.mrb[2].mxu0 %v5827_v15  ;;  %2130 = vmatmul.mubr.f32.vlgmr.msra.gmra.mrb[2].mxu1 %v5827_v15 }
  0xa2   : > { %1674 = vmatpush1.msra.mxu0 %v5897_v52  ;;  %2139 = vmatpush1.msra.mxu1 %v5899_v53  ;;  %v3684_v52 = vsub.f32 %v348_v44, %v6021_v48  ;;  %v3225_v53 = vsub.f32 %v342_v45, %v6025_v49  ;;  %v3692_v62 = vsub.f32 %v3690_v54, %v3691_v58  ;;  %v3222_v63 = vand.u32 4294901760, %v3221_v59 }
  0xa3   : > { %1737 = vmatprep.mubr.f32.mxu0 %v5620_v0  ;;  %2202 = vmatprep.mubr.f32.mxu1 %v5620_v0 }
  0xa4   : > { %2211 = vmatprep.subr.mxu0 %v5955_v16  ;;  %2676 = vmatprep.subr.mxu1 %v5957_v17  ;;  %v3685_v56 = vand.u32 4294901760, %v3684_v52  ;;  %v3226_v57 = vand.u32 4294901760, %v3225_v53  ;;  %v3693_v3 = vand.u32 4294901760, %v3692_v62 }
  0xa6   : > { %v3686_v60 = vsub.f32 %v3684_v52, %v3685_v56  ;;  %v3227_v61 = vsub.f32 %v3225_v53, %v3226_v57 }
  0xa8   : > { %v3687_v1 = vand.u32 4294901760, %v3686_v60  ;;  %v3228_v2 = vand.u32 4294901760, %v3227_v61 }
  0xa9   : > { %1739 = vmatmul.mubr.f32.vlgmr.msra.gmra.mrb[2].mxu0 %v5827_v15  ;;  %2204 = vmatmul.mubr.f32.vlgmr.msra.gmra.mrb[2].mxu1 %v5827_v15 }
  0xaa   : > { %2213 = vmatpush1.msra.mxu0 %v5961_v18  ;;  %2276 = vmatprep.mubr.f32.mxu0 %v5620_v0 }
  0xab   : > { %2678 = vmatpush1.msra.mxu1 %v5963_v19  ;;  %2741 = vmatprep.mubr.f32.mxu1 %v5620_v0 }
  0xac   : > { %2293 = vmatprep.subr.mxu0 %v2292_v35  ;;  %2758 = vmatprep.subr.mxu1 %v2757_v36 }
  0xad   : > { %2282 = vmatmul.mubr.f32.vlgmr.msra.gmra.mrb[4].mxu0 %v5861_v33  ;;  %2747 = vmatmul.mubr.f32.vlgmr.msra.gmra.mrb[4].mxu1 %v5861_v33 }
  0xae   : > { %2299 = vmatpush1.msra.mxu0 %v2298_v37  ;;  %2764 = vmatpush1.msra.mxu1 %v2763_v38 }
  0xaf   : > { %2362 = vmatprep.mubr.f32.mxu0 %v5620_v0  ;;  %2827 = vmatprep.mubr.f32.mxu1 %v5620_v0 }
  0xb0   : > { %2372 = vmatprep.subr.mxu0 %v2289_v21  ;;  %2837 = vmatprep.subr.mxu1 %v2754_v22 }
  0xb5   : > { %2364 = vmatmul.mubr.f32.vlgmr.msra.gmra.mrb[4].mxu0 %v5827_v15  ;;  %2829 = vmatmul.mubr.f32.vlgmr.msra.gmra.mrb[4].mxu1 %v5827_v15 }
  0xb6   : > { %2375 = vmatpush1.msra.mxu0 %v5972_v23  ;;  %2840 = vmatpush1.msra.mxu1 %v5975_v24 }
  0xb7   : > { %2438 = vmatprep.mubr.f32.mxu0 %v5620_v0  ;;  %2903 = vmatprep.mubr.f32.mxu1 %v5620_v0 }
  0xb8   : > { %2448 = vmatprep.subr.mxu0 %v5955_v16  ;;  %2913 = vmatprep.subr.mxu1 %v5957_v17 }
  0xbd   : > { %2441 = vmatmul.mubr.f32.vlgmr.msra.gmra.mrb[4].mxu0 %v5840_v20  ;;  %2906 = vmatmul.mubr.f32.vlgmr.msra.gmra.mrb[4].mxu1 %v5840_v20 }
  0xbe   : > { %2450 = vmatpush1.msra.mxu0 %v5961_v18  ;;  %2915 = vmatpush1.msra.mxu1 %v5963_v19 }
  0xbf   : > { %2513 = vmatprep.mubr.f32.mxu0 %v5620_v0  ;;  %2978 = vmatprep.mubr.f32.mxu1 %v5620_v0 }
  0xc0   : > { %2526 = vmatprep.subr.mxu0 %v2290_v26  ;;  %2991 = vmatprep.subr.mxu1 %v2755_v27 }
  0xc5   : > { %2517 = vmatmul.mubr.f32.vlgmr.msra.gmra.mrb[4].mxu0 %v5851_v25  ;;  %2982 = vmatmul.mubr.f32.vlgmr.msra.gmra.mrb[4].mxu1 %v5851_v25 }
  0xc6   : > { %2530 = vmatpush1.msra.mxu0 %v2296_v28  ;;  %2995 = vmatpush1.msra.mxu1 %v2761_v29 }
  0xc7   : > { %2593 = vmatprep.mubr.f32.mxu0 %v5620_v0  ;;  %3058 = vmatprep.mubr.f32.mxu1 %v5620_v0 }
  0xc8   : > { %2602 = vmatprep.subr.mxu0 %v5955_v16  ;;  %3067 = vmatprep.subr.mxu1 %v5957_v17 }
  0xca   : > { %v6109_v21 = vpop.permute.xlu1 %4251 }
  0xcd   : > { %2595 = vmatmul.mubr.f32.vlgmr.msra.gmra.mrb[4].mxu0 %v5827_v15  ;;  %3060 = vmatmul.mubr.f32.vlgmr.msra.gmra.mrb[4].mxu1 %v5827_v15 }
  0xce   : > { %2604 = vmatpush1.msra.mxu0 %v5961_v18  ;;  %3069 = vmatpush1.msra.mxu1 %v5963_v19 }
  0xcf   : > { %2667 = vmatprep.mubr.f32.mxu0 %v5620_v0  ;;  %3132 = vmatprep.mubr.f32.mxu1 %v5620_v0  ;;  %v6130_v42 = vpop.permute.xlu1 %4355 }
  0xd0   : > { %3141 = vmatprep.subr.mxu0 %v6019_v47  ;;  %3606 = vmatprep.subr.mxu1 %v6021_v48 }
  0xd5   : > { %2669 = vmatmul.mubr.f32.vlgmr.msra.gmra.mrb[4].mxu0 %v5827_v15  ;;  %3134 = vmatmul.mubr.f32.vlgmr.msra.gmra.mrb[4].mxu1 %v5827_v15 }
  0xd6   : > { %3143 = vmatpush1.msra.mxu0 %v6025_v49  ;;  %3206 = vmatprep.mubr.f32.mxu0 %v5620_v0 }
  0xd7   : > { %3608 = vmatpush1.msra.mxu1 %v6027_v50  ;;  %3671 = vmatprep.mubr.f32.mxu1 %v5620_v0 }
  0xd8   : > { %3223 = vmatprep.subr.mxu0 %v3222_v63  ;;  %3688 = vmatprep.subr.mxu1 %v3687_v1  ;;  %v6139_v59 = vpop.permute.xlu1 %4335 }
  0xd9   : > { %3212 = vmatmul.mubr.f32.vlgmr.msra.gmra.mrb[6].mxu0 %v5861_v33  ;;  %3677 = vmatmul.mubr.f32.vlgmr.msra.gmra.mrb[6].mxu1 %v5861_v33 }
  0xda   : > { %3229 = vmatpush1.msra.mxu0 %v3228_v2  ;;  %3694 = vmatpush1.msra.mxu1 %v3693_v3 }
  0xdb   : > { %3292 = vmatprep.mubr.f32.mxu0 %v5620_v0  ;;  %3757 = vmatprep.mubr.f32.mxu1 %v5620_v0 }
  0xdc   : > { %3302 = vmatprep.subr.mxu0 %v3219_v51  ;;  %3767 = vmatprep.subr.mxu1 %v3684_v52 }
  0xe1   : > { %3294 = vmatmul.mubr.f32.vlgmr.msra.gmra.mrb[6].mxu0 %v5827_v15  ;;  %3759 = vmatmul.mubr.f32.vlgmr.msra.gmra.mrb[6].mxu1 %v5827_v15 }
  0xe2   : > { %3305 = vmatpush1.msra.mxu0 %v3225_v53  ;;  %3770 = vmatpush1.msra.mxu1 %v3690_v54 }
  0xe3   : > { %3368 = vmatprep.mubr.f32.mxu0 %v5620_v0  ;;  %3833 = vmatprep.mubr.f32.mxu1 %v5620_v0 }
  0xe4   : > { %3378 = vmatprep.subr.mxu0 %v6019_v47  ;;  %3843 = vmatprep.subr.mxu1 %v6021_v48 }
  0xe9   : > { %3371 = vmatmul.mubr.f32.vlgmr.msra.gmra.mrb[6].mxu0 %v5840_v20  ;;  %3836 = vmatmul.mubr.f32.vlgmr.msra.gmra.mrb[6].mxu1 %v5840_v20  ;;  %v6083_v20 = vpop.permute.xlu0 %294 }
  0xea   : > { %3380 = vmatpush1.msra.mxu0 %v6025_v49  ;;  %3845 = vmatpush1.msra.mxu1 %v6027_v50 }
  0xeb   : > { %3443 = vmatprep.mubr.f32.mxu0 %v5620_v0  ;;  %3908 = vmatprep.mubr.f32.mxu1 %v5620_v0 }
  0xec   : > { %3456 = vmatprep.subr.mxu0 %v3220_v55  ;;  %3921 = vmatprep.subr.mxu1 %v3685_v56 }
  0xed   : > { %v6100_v13 = vpop.permute.xlu0 %4087 }
  0xf1   : > { %3447 = vmatmul.mubr.f32.vlgmr.msra.gmra.mrb[6].mxu0 %v5851_v25  ;;  %3912 = vmatmul.mubr.f32.vlgmr.msra.gmra.mrb[6].mxu1 %v5851_v25 }
  0xf2   : > { %3460 = vmatpush1.msra.mxu0 %v3226_v57  ;;  %3925 = vmatpush1.msra.mxu1 %v3691_v58 }
  0xf3   : > { %3523 = vmatprep.mubr.f32.mxu0 %v5620_v0  ;;  %3988 = vmatprep.mubr.f32.mxu1 %v5620_v0 }
  0xf4   : > { %3532 = vmatprep.subr.mxu0 %v6019_v47  ;;  %3997 = vmatprep.subr.mxu1 %v6021_v48 }
  0xf9   : > { %3525 = vmatmul.mubr.f32.vlgmr.msra.gmra.mrb[6].mxu0 %v5827_v15  ;;  %3990 = vmatmul.mubr.f32.vlgmr.msra.gmra.mrb[6].mxu1 %v5827_v15 }
  0xfa   : > { %3534 = vmatpush1.msra.mxu0 %v6025_v49  ;;  %3999 = vmatpush1.msra.mxu1 %v6027_v50 }
  0xfb   : > { %3597 = vmatprep.mubr.f32.mxu0 %v5620_v0  ;;  %4062 = vmatprep.mubr.f32.mxu1 %v5620_v0 }
 0x101   : > { %3599 = vmatmul.mubr.f32.vlgmr.msra.gmra.mrb[6].mxu0 %v5827_v15  ;;  %4064 = vmatmul.mubr.f32.vlgmr.msra.gmra.mrb[6].mxu1 %v5827_v15 }
 0x102   : > { %4474 = vmatprep.mubr.f32.mxu0 %v5620_v0  ;;  %4545 = vmatprep.mubr.f32.mxu1 %v5620_v0 }
 0x150   : > { %v810_v25 = vpop.f32.mrb[0].mxu0  ;;  %v1275_v33 = vpop.f32.mrb[0].mxu1 }
 0x151   : > { %v5183_v4 = vadd.f32 %v810_v25, %v6083_v20  ;;  %v812_v5 = vpop.f32.mrb[1].mxu0  ;;  %v1277_v6 = vpop.f32.mrb[1].mxu1  ;;  %v5185_v11 = vadd.f32 %v1275_v33, %v6083_v20 }
 0x152   : > { %v5184_v7 = vadd.f32 %v812_v5, %v6083_v20  ;;  %v5186_v8 = vadd.f32 %v1277_v6, %v6083_v20 }
 0x153   : > { %v6088_v9 = vmax.f32 %v5183_v4, 0.0  ;;  %v6098_v12 = vmax.f32 %v5185_v11, 0.0 }
 0x154   : > { %v6090_v10 = vmax.f32 %v5184_v7, 0.0  ;;  %v6092_v15 = vmax.f32 %v5186_v8, 0.0  ;;  %v6155_v7 = vld [vmem:[%s279_s18] sm:$0xf]  ;;  %s5626_s18 = smov [#allocation5]  }
 0x155   : > { %5401 = vrsqrt.f32 %v6088_v9  ;;  %v4090_v16 = vmul.f32 %v6100_v13, %v6088_v9  ;;  %vm4140_vm3 = vcmp.eq.f32.partialorder %v6088_v9, inf  ;;  %vm4142_vm4 = vcmp.eq.f32.partialorder %v6088_v9, 0.0  ;;  %s5499_s26 = sshll.u32 %s5626_s18, 4  ;;  %s5500_s26 = int_to_ptr.vmem [resolvable:$false] %s5499_s26 }
 0x156   : > { %5403 = vrsqrt.f32 %v6090_v10  ;;  %v4091_v14 = vmul.f32 %v6100_v13, %v6090_v10  ;;  %v4093_v18 = vmul.f32 %v6100_v13, %v6092_v15  ;;  %vm4147_vm2 = vcmp.eq.f32.partialorder %v6090_v10, inf  ;;  %s5501_s9 = scalar_lea.vmem %s5500_s26, 2048  ;;  %p5502_p1 = scmp.lt.s32.totalorder %s6397_s28, %s5500_s26 }
 0x157   : > { %5405 = vrsqrt.f32 %v6092_v15  ;;  %vm4149_vm5 = vcmp.eq.f32.partialorder %v6090_v10, 0.0  ;;  %v4143_v26 = vand.u32 2147483648, %v6088_v9  ;;  %v4150_v28 = vand.u32 2147483648, %v6090_v10  ;;  %p5503_p7 = scmp.lt.s32.totalorder %s5501_s9, %s5495_s22 }
 0x158   : > { %5407 = vrsqrt.f32 %v6098_v12  ;;  %v4108_v23 = vmul.f32 1.442695, %v4091_v14  ;;  %vm4161_vm6 = vcmp.eq.f32.partialorder %v6092_v15, inf  ;;  %v4106_v29 = vmul.f32 1.442695, %v4090_v16 }
 0x159   : > { %v4112_v32 = vmul.f32 1.442695, %v4093_v18  ;;  %v4164_v37 = vand.u32 2147483648, %v6092_v15  ;;  %v4092_v39 = vmul.f32 %v6100_v13, %v6098_v12  ;;  %vm4163_vm7 = vcmp.eq.f32.partialorder %v6092_v15, 0.0  ;;  %p5504_p10 = por %p5503_p7, %p5502_p1 }
 0x15a   : > { %5409 = vpow2.f32 %v4108_v23  ;;  %vm4154_vm8 = vcmp.eq.f32.partialorder %v6098_v12, inf  ;;  %v4157_v53 = vand.u32 2147483648, %v6098_v12  ;;  %vm4156_vm9 = vcmp.eq.f32.partialorder %v6098_v12, 0.0 }
 0x15b   : > { %5411 = vpow2.f32 %v4106_v29  ;;  %v4110_v49 = vmul.f32 1.442695, %v4092_v39  ;;  %vm4358_vm10 = vcmp.lt.f32.partialorder %v6088_v9, %v6130_v42  ;;  %vm4359_vm11 = vcmp.lt.f32.partialorder %v6090_v10, %v6130_v42  ;;  %p5505_p3 = pnand %p5504_p10, %p5498_p11 }
 0x15c   : > { %5413 = vpow2.f32 %v4112_v32  ;;  %vm4339_vm12 = vcmp.le.f32.partialorder %v6090_v10, %v6139_v59  ;;  %vm4361_vm14 = vcmp.lt.f32.partialorder %v6092_v15, %v6130_v42  ;;  %vm4338_vm15 = vcmp.le.f32.partialorder %v6088_v9, %v6139_v59 }
 0x15d   : > { %5415 = vpow2.f32 %v4110_v49  ;;  %vm4341_vm0 = vcmp.le.f32.partialorder %v6092_v15, %v6139_v59  ;;  %vm4360_vm1 = vcmp.lt.f32.partialorder %v6098_v12, %v6130_v42 }
 0x15f   : > { %v5402_v17 = vpop.eup %5401 }
 0x160   : > { %v5404_v19 = vpop.eup %5403  ;;  %v4139_v22 = vmul.f32 %v5402_v17, %v6088_v9 }
 0x161   : > { %v4146_v24 = vmul.f32 %v5404_v19, %v6090_v10  ;;  %v5406_v27 = vpop.eup %5405 }
 0x162   : > { %v4141_v30 = vsel %vm4140_vm3, %v6088_v9, %v4139_v22  ;;  %v4160_v34 = vmul.f32 %v5406_v27, %v6092_v15  ;;  %v5408_v45 = vpop.eup %5407 }
 0x163   : > { %v4148_v31 = vsel %vm4147_vm2, %v6090_v10, %v4146_v24  ;;  %v4144_v35 = vsel %vm4142_vm4, %v4143_v26, %v4141_v30  ;;  %v4153_v50 = vmul.f32 %v5408_v45, %v6098_v12  ;;  %vm4340_vm2 = vcmp.le.f32.partialorder %v6098_v12, %v6139_v59 }
 0x164   : > { %v4151_v36 = vsel %vm4149_vm5, %v4150_v28, %v4148_v31  ;;  %v4254_v38 = vmul.f32 %v6109_v21, %v4144_v35  ;;  %v4162_v41 = vsel %vm4161_vm6, %v6092_v15, %v4160_v34  ;;  %v5410_v3 = vpop.eup %5409 }
 0x165   : > { %v4255_v40 = vmul.f32 %v6109_v21, %v4151_v36  ;;  %v4165_v43 = vsel %vm4163_vm7, %v4164_v37, %v4162_v41  ;;  %v4155_v55 = vsel %vm4154_vm8, %v6098_v12, %v4153_v50  ;;  %v5412_v4 = vpop.eup %5411 }
 0x166   : > { %v4270_v44 = vmul.f32 0.5413411, %v4254_v38  ;;  %v4257_v47 = vmul.f32 %v6109_v21, %v4165_v43  ;;  %v4158_v58 = vsel %vm4156_vm9, %v4157_v53, %v4155_v55  ;;  %v5414_v8 = vpop.eup %5413 }
 0x167   : > { %v4271_v46 = vmul.f32 0.5413411, %v4255_v40  ;;  %v4256_v61 = vmul.f32 %v6109_v21, %v4158_v58  ;;  %v5416_v9 = vpop.eup %5415 }
 0x168   : > { %v4286_v48 = vadd.f32 -1.6240234, %v4270_v44  ;;  %v4273_v52 = vmul.f32 0.5413411, %v4257_v47 }
 0x169   : > { %v4287_v51 = vadd.f32 -1.6240234, %v4271_v46  ;;  %v4272_v2 = vmul.f32 0.5413411, %v4256_v61 }
 0x16a   : > { %v4302_v54 = vmul.f32 %v4286_v48, %v4254_v38  ;;  %v4289_v57 = vadd.f32 -1.6240234, %v4273_v52 }
 0x16b   : > { %v4303_v56 = vmul.f32 %v4287_v51, %v4255_v40  ;;  %v4288_v6 = vadd.f32 -1.6240234, %v4272_v2 }
 0x16c   : > { %v4318_v60 = vadd.f32 1.2180176, %v4302_v54  ;;  %v4305_v63 = vmul.f32 %v4289_v57, %v4257_v47 }
 0x16d   : > { %v4319_v62 = vadd.f32 1.2180176, %v4303_v56  ;;  %v4304_v16 = vmul.f32 %v4288_v6, %v4256_v61 }
 0x16e   : > { %v4374_v1 = vsel %vm4358_vm10, %v4318_v60, 0.0  ;;  %v4321_v33 = vadd.f32 1.2180176, %v4305_v63 }
 0x16f   : > { %v4375_v25 = vsel %vm4359_vm11, %v4319_v62, 0.0  ;;  %v4390_v11 = vsel %vm4338_vm15, %v5412_v4, %v4374_v1  ;;  %v4320_v17 = vadd.f32 1.2180176, %v4304_v16 }
 0x170   : > { %v4391_v5 = vsel %vm4339_vm12, %v5410_v3, %v4375_v25  ;;  %v4377_v10 = vsel %vm4361_vm14, %v4321_v33, 0.0 }
 0x171   : > { %4410 = vmatprep.subr.mxu0 %v4391_v5  ;;  %v4393_v14 = vsel %vm4341_vm0, %v5414_v8, %v4377_v10  ;;  %v4376_v15 = vsel %vm4360_vm1, %v4320_v17, 0.0 }
 0x172   : > { %4411 = vmatpush1.msra.mxu0 %v4390_v11  ;;  %4481 = vmatprep.subr.mxu1 %v4393_v14  ;;  %v4392_v18 = vsel %vm4340_vm2, %v5416_v9, %v4376_v15 }
 0x173   : > { %5168 = vmatmul.mubr.msk.f32.vlgmr.msra.gmra.mrb[8].mxu0 %vm4406_vm13, %v6155_v7  ;;  %4482 = vmatpush1.msra.mxu1 %v4392_v18 }
 0x174   : > { %4616 = vmatprep.mubr.f32.mxu0 %v5620_v0  ;;  %5169 = vmatmul.mubr.msk.f32.vlgmr.msra.gmra.mrb[8].mxu1 %vm4406_vm13, %v6155_v7 }
 0x175   : > { %4687 = vmatprep.mubr.f32.mxu1 %v5620_v0 }
 0x17c   : > { %v1740_v19 = vpop.f32.mrb[2].mxu0  ;;  %v2205_v22 = vpop.f32.mrb[2].mxu1 }
 0x17d   : > { %v5187_v23 = vadd.f32 %v1740_v19, %v6083_v20  ;;  %v1742_v24 = vpop.f32.mrb[3].mxu0  ;;  %v2207_v26 = vpop.f32.mrb[3].mxu1  ;;  %v5189_v31 = vadd.f32 %v2205_v22, %v6083_v20 }
 0x17e   : > { %v5188_v27 = vadd.f32 %v1742_v24, %v6083_v20  ;;  %v5190_v28 = vadd.f32 %v2207_v26, %v6083_v20 }
 0x17f   : > { %v6172_v29 = vmax.f32 %v5187_v23, 0.0  ;;  %v6182_v32 = vmax.f32 %v5189_v31, 0.0 }
 0x180   : > { %v6174_v12 = vmax.f32 %v5188_v27, 0.0  ;;  %v6176_v30 = vmax.f32 %v5190_v28, 0.0 }
 0x181   : > { %5417 = vrsqrt.f32 %v6172_v29  ;;  %v4094_v35 = vmul.f32 %v6100_v13, %v6172_v29  ;;  %vm4168_vm4 = vcmp.eq.f32.partialorder %v6172_v29, inf  ;;  %vm4170_vm5 = vcmp.eq.f32.partialorder %v6172_v29, 0.0 }
 0x182   : > { %5419 = vrsqrt.f32 %v6174_v12  ;;  %v4095_v34 = vmul.f32 %v6100_v13, %v6174_v12  ;;  %v4097_v37 = vmul.f32 %v6100_v13, %v6176_v30  ;;  %vm4175_vm3 = vcmp.eq.f32.partialorder %v6174_v12, inf }
 0x183   : > { %5421 = vrsqrt.f32 %v6176_v30  ;;  %vm4177_vm6 = vcmp.eq.f32.partialorder %v6174_v12, 0.0  ;;  %v4171_v43 = vand.u32 2147483648, %v6172_v29  ;;  %v4178_v45 = vand.u32 2147483648, %v6174_v12 }
 0x184   : > { %5423 = vrsqrt.f32 %v6182_v32  ;;  %v4116_v40 = vmul.f32 1.442695, %v4095_v34  ;;  %vm4189_vm7 = vcmp.eq.f32.partialorder %v6176_v30, inf  ;;  %v4114_v46 = vmul.f32 1.442695, %v4094_v35 }
 0x185   : > { %v4120_v49 = vmul.f32 1.442695, %v4097_v37  ;;  %v4192_v53 = vand.u32 2147483648, %v6176_v30  ;;  %v4096_v55 = vmul.f32 %v6100_v13, %v6182_v32  ;;  %vm4191_vm8 = vcmp.eq.f32.partialorder %v6176_v30, 0.0 }
 0x186   : > { %5425 = vpow2.f32 %v4116_v40  ;;  %vm4182_vm9 = vcmp.eq.f32.partialorder %v6182_v32, inf  ;;  %v4185_v4 = vand.u32 2147483648, %v6182_v32  ;;  %vm4184_vm10 = vcmp.eq.f32.partialorder %v6182_v32, 0.0 }
 0x187   : > { %5427 = vpow2.f32 %v4114_v46  ;;  %v4118_v2 = vmul.f32 1.442695, %v4096_v55  ;;  %vm4362_vm11 = vcmp.lt.f32.partialorder %v6172_v29, %v6130_v42  ;;  %vm4363_vm12 = vcmp.lt.f32.partialorder %v6174_v12, %v6130_v42 }
 0x188   : > { %5429 = vpow2.f32 %v4120_v49  ;;  %vm4343_vm14 = vcmp.le.f32.partialorder %v6174_v12, %v6139_v59  ;;  %vm4365_vm15 = vcmp.lt.f32.partialorder %v6176_v30, %v6130_v42  ;;  %vm4342_vm0 = vcmp.le.f32.partialorder %v6172_v29, %v6139_v59 }
 0x189   : > { %5431 = vpow2.f32 %v4118_v2  ;;  %vm4345_vm1 = vcmp.le.f32.partialorder %v6176_v30, %v6139_v59  ;;  %vm4364_vm2 = vcmp.lt.f32.partialorder %v6182_v32, %v6130_v42 }
 0x18b   : > { %v5418_v36 = vpop.eup %5417 }
 0x18c   : > { %v5420_v38 = vpop.eup %5419  ;;  %v4167_v39 = vmul.f32 %v5418_v36, %v6172_v29 }
 0x18d   : > { %v4174_v41 = vmul.f32 %v5420_v38, %v6174_v12  ;;  %v5422_v44 = vpop.eup %5421 }
 0x18e   : > { %v4169_v47 = vsel %vm4168_vm4, %v6172_v29, %v4167_v39  ;;  %v4188_v50 = vmul.f32 %v5422_v44, %v6176_v30  ;;  %v5424_v61 = vpop.eup %5423 }
 0x18f   : > { %v4176_v48 = vsel %vm4175_vm3, %v6174_v12, %v4174_v41  ;;  %v4172_v51 = vsel %vm4170_vm5, %v4171_v43, %v4169_v47  ;;  %v4181_v3 = vmul.f32 %v5424_v61, %v6182_v32  ;;  %vm4344_vm3 = vcmp.le.f32.partialorder %v6182_v32, %v6139_v59 }
 0x190   : > { %v4179_v52 = vsel %vm4177_vm6, %v4178_v45, %v4176_v48  ;;  %v4258_v54 = vmul.f32 %v6109_v21, %v4172_v51  ;;  %v4190_v57 = vsel %vm4189_vm7, %v6176_v30, %v4188_v50  ;;  %v5426_v19 = vpop.eup %5425 }
 0x191   : > { %v4259_v56 = vmul.f32 %v6109_v21, %v4179_v52  ;;  %v4193_v58 = vsel %vm4191_vm8, %v4192_v53, %v4190_v57  ;;  %v4183_v6 = vsel %vm4182_vm9, %v6182_v32, %v4181_v3  ;;  %v5428_v24 = vpop.eup %5427 }
 0x192   : > { %v4274_v60 = vmul.f32 0.5413411, %v4258_v54  ;;  %v4261_v63 = vmul.f32 %v6109_v21, %v4193_v58  ;;  %v4186_v11 = vsel %vm4184_vm10, %v4185_v4, %v4183_v6  ;;  %v5430_v28 = vpop.eup %5429 }
 0x193   : > { %v4275_v62 = vmul.f32 0.5413411, %v4259_v56  ;;  %v4260_v16 = vmul.f32 %v6109_v21, %v4186_v11  ;;  %v5432_v29 = vpop.eup %5431 }
 0x194   : > { %v4290_v1 = vadd.f32 -1.6240234, %v4274_v60  ;;  %v4277_v33 = vmul.f32 0.5413411, %v4261_v63 }
 0x195   : > { %v4291_v25 = vadd.f32 -1.6240234, %v4275_v62  ;;  %v4276_v18 = vmul.f32 0.5413411, %v4260_v16 }
 0x196   : > { %v4306_v5 = vmul.f32 %v4290_v1, %v4258_v54  ;;  %v4293_v10 = vadd.f32 -1.6240234, %v4277_v33 }
 0x197   : > { %v4307_v8 = vmul.f32 %v4291_v25, %v4259_v56  ;;  %v4292_v27 = vadd.f32 -1.6240234, %v4276_v18 }
 0x198   : > { %v4322_v14 = vadd.f32 1.2180176, %v4306_v5  ;;  %v4309_v9 = vmul.f32 %v4293_v10, %v4261_v63 }
 0x199   : > { %v4323_v17 = vadd.f32 1.2180176, %v4307_v8  ;;  %v4308_v12 = vmul.f32 %v4292_v27, %v4260_v16 }
 0x19a   : > { %v4378_v15 = vsel %vm4362_vm11, %v4322_v14, 0.0  ;;  %v4325_v23 = vadd.f32 1.2180176, %v4309_v9 }
 0x19b   : > { %v4379_v22 = vsel %vm4363_vm12, %v4323_v17, 0.0  ;;  %v4394_v34 = vsel %vm4342_vm0, %v5428_v24, %v4378_v15  ;;  %v4324_v36 = vadd.f32 1.2180176, %v4308_v12 }
 0x19c   : > { %v4395_v26 = vsel %vm4343_vm14, %v5426_v19, %v4379_v22  ;;  %v4381_v31 = vsel %vm4365_vm15, %v4325_v23, 0.0 }
 0x19d   : > { %4552 = vmatprep.subr.mxu0 %v4395_v26  ;;  %v4397_v35 = vsel %vm4345_vm1, %v5430_v28, %v4381_v31  ;;  %v4380_v30 = vsel %vm4364_vm2, %v4324_v36, 0.0 }
 0x19e   : > { %4553 = vmatpush1.msra.mxu0 %v4394_v34  ;;  %4623 = vmatprep.subr.mxu1 %v4397_v35  ;;  %v4396_v37 = vsel %vm4344_vm3, %v5432_v29, %v4380_v30 }
 0x19f   : > { %5170 = vmatmul.mubr.msk.f32.vlgmr.msra.gmra.mrb[10].mxu0 %vm4406_vm13, %v6155_v7  ;;  %4624 = vmatpush1.msra.mxu1 %v4396_v37 }
 0x1a0   : > { %4758 = vmatprep.mubr.f32.mxu0 %v5620_v0  ;;  %5171 = vmatmul.mubr.msk.f32.vlgmr.msra.gmra.mrb[10].mxu1 %vm4406_vm13, %v6155_v7 }
 0x1a1   : > { %4829 = vmatprep.mubr.f32.mxu1 %v5620_v0 }
 0x1a8   : > { %v2670_v38 = vpop.f32.mrb[4].mxu0  ;;  %v3135_v39 = vpop.f32.mrb[4].mxu1 }
 0x1a9   : > { %v5191_v40 = vadd.f32 %v2670_v38, %v6083_v20  ;;  %v2672_v41 = vpop.f32.mrb[5].mxu0  ;;  %v3137_v43 = vpop.f32.mrb[5].mxu1  ;;  %v5193_v48 = vadd.f32 %v3135_v39, %v6083_v20 }
 0x1aa   : > { %v5192_v44 = vadd.f32 %v2672_v41, %v6083_v20  ;;  %v5194_v45 = vadd.f32 %v3137_v43, %v6083_v20 }
 0x1ab   : > { %v6242_v46 = vmax.f32 %v5191_v40, 0.0  ;;  %v6252_v49 = vmax.f32 %v5193_v48, 0.0 }
 0x1ac   : > { %v6244_v32 = vmax.f32 %v5192_v44, 0.0  ;;  %v6246_v47 = vmax.f32 %v5194_v45, 0.0 }
 0x1ad   : > { %5433 = vrsqrt.f32 %v6242_v46  ;;  %v4098_v51 = vmul.f32 %v6100_v13, %v6242_v46  ;;  %vm4196_vm5 = vcmp.eq.f32.partialorder %v6242_v46, inf  ;;  %vm4198_vm6 = vcmp.eq.f32.partialorder %v6242_v46, 0.0 }
 0x1ae   : > { %5435 = vrsqrt.f32 %v6244_v32  ;;  %v4099_v50 = vmul.f32 %v6100_v13, %v6244_v32  ;;  %v4101_v53 = vmul.f32 %v6100_v13, %v6246_v47  ;;  %vm4203_vm4 = vcmp.eq.f32.partialorder %v6244_v32, inf }
 0x1af   : > { %5437 = vrsqrt.f32 %v6246_v47  ;;  %vm4205_vm7 = vcmp.eq.f32.partialorder %v6244_v32, 0.0  ;;  %v4199_v58 = vand.u32 2147483648, %v6242_v46  ;;  %v4206_v61 = vand.u32 2147483648, %v6244_v32 }
 0x1b0   : > { %5439 = vrsqrt.f32 %v6252_v49  ;;  %v4124_v56 = vmul.f32 1.442695, %v4099_v50  ;;  %vm4217_vm8 = vcmp.eq.f32.partialorder %v6246_v47, inf  ;;  %v4122_v62 = vmul.f32 1.442695, %v4098_v51 }
 0x1b1   : > { %v4128_v2 = vmul.f32 1.442695, %v4101_v53  ;;  %v4220_v4 = vand.u32 2147483648, %v6246_v47  ;;  %v4100_v6 = vmul.f32 %v6100_v13, %v6252_v49  ;;  %vm4219_vm9 = vcmp.eq.f32.partialorder %v6246_v47, 0.0 }
 0x1b2   : > { %5441 = vpow2.f32 %v4124_v56  ;;  %vm4210_vm10 = vcmp.eq.f32.partialorder %v6252_v49, inf  ;;  %v4213_v24 = vand.u32 2147483648, %v6252_v49  ;;  %vm4212_vm11 = vcmp.eq.f32.partialorder %v6252_v49, 0.0 }
 0x1b3   : > { %5443 = vpow2.f32 %v4122_v62  ;;  %v4126_v18 = vmul.f32 1.442695, %v4100_v6  ;;  %vm4366_vm12 = vcmp.lt.f32.partialorder %v6242_v46, %v6130_v42  ;;  %vm4367_vm14 = vcmp.lt.f32.partialorder %v6244_v32, %v6130_v42 }
 0x1b4   : > { %5445 = vpow2.f32 %v4128_v2  ;;  %vm4347_vm15 = vcmp.le.f32.partialorder %v6244_v32, %v6139_v59  ;;  %vm4369_vm0 = vcmp.lt.f32.partialorder %v6246_v47, %v6130_v42  ;;  %vm4346_vm1 = vcmp.le.f32.partialorder %v6242_v46, %v6139_v59 }
 0x1b5   : > { %5447 = vpow2.f32 %v4126_v18  ;;  %vm4349_vm2 = vcmp.le.f32.partialorder %v6246_v47, %v6139_v59  ;;  %vm4368_vm3 = vcmp.lt.f32.partialorder %v6252_v49, %v6130_v42 }
 0x1b7   : > { %v5434_v52 = vpop.eup %5433 }
 0x1b8   : > { %v5436_v54 = vpop.eup %5435  ;;  %v4195_v55 = vmul.f32 %v5434_v52, %v6242_v46 }
 0x1b9   : > { %v4202_v57 = vmul.f32 %v5436_v54, %v6244_v32  ;;  %v5438_v60 = vpop.eup %5437 }
 0x1ba   : > { %v4197_v63 = vsel %vm4196_vm5, %v6242_v46, %v4195_v55  ;;  %v4216_v3 = vmul.f32 %v5438_v60, %v6246_v47  ;;  %v5440_v16 = vpop.eup %5439 }
 0x1bb   : > { %v4204_v1 = vsel %vm4203_vm4, %v6244_v32, %v4202_v57  ;;  %v4200_v25 = vsel %vm4198_vm6, %v4199_v58, %v4197_v63  ;;  %v4209_v19 = vmul.f32 %v5440_v16, %v6252_v49  ;;  %vm4348_vm4 = vcmp.le.f32.partialorder %v6252_v49, %v6139_v59 }
 0x1bc   : > { %v4207_v33 = vsel %vm4205_vm7, %v4206_v61, %v4204_v1  ;;  %v4262_v5 = vmul.f32 %v6109_v21, %v4200_v25  ;;  %v4218_v10 = vsel %vm4217_vm8, %v6246_v47, %v4216_v3  ;;  %v5442_v38 = vpop.eup %5441 }
 0x1bd   : > { %v4263_v8 = vmul.f32 %v6109_v21, %v4207_v33  ;;  %v4221_v11 = vsel %vm4219_vm9, %v4220_v4, %v4218_v10  ;;  %v4211_v27 = vsel %vm4210_vm10, %v6252_v49, %v4209_v19  ;;  %v5444_v41 = vpop.eup %5443 }
 0x1be   : > { %v4278_v14 = vmul.f32 0.5413411, %v4262_v5  ;;  %v4265_v9 = vmul.f32 %v6109_v21, %v4221_v11  ;;  %v4214_v34 = vsel %vm4212_vm11, %v4213_v24, %v4211_v27  ;;  %v5446_v45 = vpop.eup %5445 }
 0x1bf   : > { %v4279_v17 = vmul.f32 0.5413411, %v4263_v8  ;;  %v4264_v12 = vmul.f32 %v6109_v21, %v4214_v34  ;;  %v5448_v46 = vpop.eup %5447 }
 0x1c0   : > { %v4294_v15 = vadd.f32 -1.6240234, %v4278_v14  ;;  %v4281_v23 = vmul.f32 0.5413411, %v4265_v9 }
 0x1c1   : > { %v4295_v22 = vadd.f32 -1.6240234, %v4279_v17  ;;  %v4280_v37 = vmul.f32 0.5413411, %v4264_v12 }
 0x1c2   : > { %v4310_v26 = vmul.f32 %v4294_v15, %v4262_v5  ;;  %v4297_v31 = vadd.f32 -1.6240234, %v4281_v23 }
 0x1c3   : > { %v4311_v28 = vmul.f32 %v4295_v22, %v4263_v8  ;;  %v4296_v44 = vadd.f32 -1.6240234, %v4280_v37 }
 0x1c4   : > { %v4326_v35 = vadd.f32 1.2180176, %v4310_v26  ;;  %v4313_v29 = vmul.f32 %v4297_v31, %v4265_v9 }
 0x1c5   : > { %v4327_v36 = vadd.f32 1.2180176, %v4311_v28  ;;  %v4312_v32 = vmul.f32 %v4296_v44, %v4264_v12 }
 0x1c6   : > { %v4382_v30 = vsel %vm4366_vm12, %v4326_v35, 0.0  ;;  %v4329_v40 = vadd.f32 1.2180176, %v4313_v29 }
 0x1c7   : > { %v4383_v39 = vsel %vm4367_vm14, %v4327_v36, 0.0  ;;  %v4398_v50 = vsel %vm4346_vm1, %v5444_v41, %v4382_v30  ;;  %v4328_v52 = vadd.f32 1.2180176, %v4312_v32 }
 0x1c8   : > { %v4399_v43 = vsel %vm4347_vm15, %v5442_v38, %v4383_v39  ;;  %v4385_v48 = vsel %vm4369_vm0, %v4329_v40, 0.0 }
 0x1c9   : > { %4694 = vmatprep.subr.mxu0 %v4399_v43  ;;  %v4401_v51 = vsel %vm4349_vm2, %v5446_v45, %v4385_v48  ;;  %v4384_v47 = vsel %vm4368_vm3, %v4328_v52, 0.0 }
 0x1ca   : > { %4695 = vmatpush1.msra.mxu0 %v4398_v50  ;;  %4765 = vmatprep.subr.mxu1 %v4401_v51  ;;  %v4400_v53 = vsel %vm4348_vm4, %v5448_v46, %v4384_v47 }
 0x1cb   : > { %5172 = vmatmul.mubr.msk.f32.vlgmr.msra.gmra.mrb[12].mxu0 %vm4406_vm13, %v6155_v7  ;;  %4766 = vmatpush1.msra.mxu1 %v4400_v53 }
 0x1cc   : > { %4900 = vmatprep.mubr.f32.mxu0 %v5620_v0  ;;  %5173 = vmatmul.mubr.msk.f32.vlgmr.msra.gmra.mrb[12].mxu1 %vm4406_vm13, %v6155_v7 }
 0x1cd   : > { %4971 = vmatprep.mubr.f32.mxu1 %v5620_v0 }
 0x1d4   : > { %v3600_v54 = vpop.f32.mrb[6].mxu0  ;;  %v4065_v55 = vpop.f32.mrb[6].mxu1 }
 0x1d5   : > { %v5195_v56 = vadd.f32 %v3600_v54, %v6083_v20  ;;  %v3602_v57 = vpop.f32.mrb[7].mxu0  ;;  %v4067_v58 = vpop.f32.mrb[7].mxu1  ;;  %v5197_v1 = vadd.f32 %v4065_v55, %v6083_v20 }
 0x1d6   : > { %v5196_v60 = vadd.f32 %v3602_v57, %v6083_v20  ;;  %v5198_v61 = vadd.f32 %v4067_v58, %v6083_v20 }
 0x1d7   : > { %v6312_v62 = vmax.f32 %v5195_v56, 0.0  ;;  %v6322_v0 = vmax.f32 %v5197_v1, 0.0 }
 0x1d8   : > { %v6314_v49 = vmax.f32 %v5196_v60, 0.0  ;;  %v6316_v63 = vmax.f32 %v5198_v61, 0.0 }
 0x1d9   : > { %5449 = vrsqrt.f32 %v6312_v62  ;;  %v4102_v3 = vmul.f32 %v6100_v13, %v6312_v62  ;;  %vm4224_vm6 = vcmp.eq.f32.partialorder %v6312_v62, inf  ;;  %vm4226_vm7 = vcmp.eq.f32.partialorder %v6312_v62, 0.0 }
 0x1da   : > { %5451 = vrsqrt.f32 %v6314_v49  ;;  %v4103_v2 = vmul.f32 %v6100_v13, %v6314_v49  ;;  %v4105_v20 = vmul.f32 %v6100_v13, %v6316_v63  ;;  %vm4231_vm5 = vcmp.eq.f32.partialorder %v6314_v49, inf }
 0x1db   : > { %5453 = vrsqrt.f32 %v6316_v63  ;;  %vm4233_vm8 = vcmp.eq.f32.partialorder %v6314_v49, 0.0  ;;  %v4227_v8 = vand.u32 2147483648, %v6312_v62  ;;  %v4234_v11 = vand.u32 2147483648, %v6314_v49 }
 0x1dc   : > { %5455 = vrsqrt.f32 %v6322_v0  ;;  %v4132_v5 = vmul.f32 1.442695, %v4103_v2  ;;  %vm4245_vm9 = vcmp.eq.f32.partialorder %v6316_v63, inf  ;;  %v4130_v14 = vmul.f32 1.442695, %v4102_v3 }
 0x1dd   : > { %v4136_v9 = vmul.f32 1.442695, %v4105_v20  ;;  %v4248_v22 = vand.u32 2147483648, %v6316_v63  ;;  %v4104_v24 = vmul.f32 %v6100_v13, %v6322_v0  ;;  %vm4247_vm10 = vcmp.eq.f32.partialorder %v6316_v63, 0.0 }
 0x1de   : > { %5457 = vpow2.f32 %v4132_v5  ;;  %vm4238_vm11 = vcmp.eq.f32.partialorder %v6322_v0, inf  ;;  %v4241_v38 = vand.u32 2147483648, %v6322_v0  ;;  %vm4240_vm12 = vcmp.eq.f32.partialorder %v6322_v0, 0.0 }
 0x1df   : > { %5459 = vpow2.f32 %v4130_v14  ;;  %v4134_v29 = vmul.f32 1.442695, %v4104_v24  ;;  %vm4370_vm14 = vcmp.lt.f32.partialorder %v6312_v62, %v6130_v42  ;;  %vm4371_vm15 = vcmp.lt.f32.partialorder %v6314_v49, %v6130_v42 }
 0x1e0   : > { %5461 = vpow2.f32 %v4136_v9  ;;  %vm4351_vm0 = vcmp.le.f32.partialorder %v6314_v49, %v6139_v59  ;;  %vm4373_vm1 = vcmp.lt.f32.partialorder %v6316_v63, %v6130_v42  ;;  %vm4350_vm2 = vcmp.le.f32.partialorder %v6312_v62, %v6139_v59 }
 0x1e1   : > { %5463 = vpow2.f32 %v4134_v29  ;;  %vm4353_vm3 = vcmp.le.f32.partialorder %v6316_v63, %v6139_v59  ;;  %vm4372_vm4 = vcmp.lt.f32.partialorder %v6322_v0, %v6130_v42 }
 0x1e3   : > { %v5450_v25 = vpop.eup %5449 }
 0x1e4   : > { %v5452_v33 = vpop.eup %5451  ;;  %v4223_v4 = vmul.f32 %v5450_v25, %v6312_v62 }
 0x1e5   : > { %v4230_v6 = vmul.f32 %v5452_v33, %v6314_v49  ;;  %v5454_v10 = vpop.eup %5453 }
 0x1e6   : > { %v4225_v16 = vsel %vm4224_vm6, %v6312_v62, %v4223_v4  ;;  %v4244_v15 = vmul.f32 %v5454_v10, %v6316_v63  ;;  %v5456_v34 = vpop.eup %5455 }
 0x1e7   : > { %v4232_v17 = vsel %vm4231_vm5, %v6314_v49, %v4230_v6  ;;  %v4228_v18 = vsel %vm4226_vm7, %v4227_v8, %v4225_v16  ;;  %v4237_v30 = vmul.f32 %v5456_v34, %v6322_v0  ;;  %vm4352_vm5 = vcmp.le.f32.partialorder %v6322_v0, %v6139_v59 }
 0x1e8   : > { %v4235_v19 = vsel %vm4233_vm8, %v4234_v11, %v4232_v17  ;;  %v4266_v23 = vmul.f32 %v6109_v21, %v4228_v18  ;;  %v4246_v27 = vsel %vm4245_vm9, %v6316_v63, %v4244_v15  ;;  %v5458_v46 = vpop.eup %5457 }
 0x1e9   : > { %v4267_v26 = vmul.f32 %v6109_v21, %v4235_v19  ;;  %v4249_v28 = vsel %vm4247_vm10, %v4248_v22, %v4246_v27  ;;  %v4239_v40 = vsel %vm4238_vm11, %v6322_v0, %v4237_v30  ;;  %v5460_v54 = vpop.eup %5459 }
 0x1ea   : > { %v4282_v31 = vmul.f32 0.5413411, %v4266_v23  ;;  %v4269_v12 = vmul.f32 %v6109_v21, %v4249_v28  ;;  %v4242_v44 = vsel %vm4240_vm12, %v4241_v38, %v4239_v40  ;;  %v5462_v56 = vpop.eup %5461 }
 0x1eb   : > { %v4283_v35 = vmul.f32 0.5413411, %v4267_v26  ;;  %v4268_v48 = vmul.f32 %v6109_v21, %v4242_v44  ;;  %v5464_v62 = vpop.eup %5463 }
 0x1ec   : > { %v4298_v36 = vadd.f32 -1.6240234, %v4282_v31  ;;  %v4285_v37 = vmul.f32 0.5413411, %v4269_v12 }
 0x1ed   : > { %v4299_v13 = vadd.f32 -1.6240234, %v4283_v35  ;;  %v4284_v52 = vmul.f32 0.5413411, %v4268_v48 }
 0x1ee   : > { %v4314_v39 = vmul.f32 %v4298_v36, %v4266_v23  ;;  %v4301_v43 = vadd.f32 -1.6240234, %v4285_v37 }
 0x1ef   : > { %v4315_v41 = vmul.f32 %v4299_v13, %v4267_v26  ;;  %v4300_v21 = vadd.f32 -1.6240234, %v4284_v52 }
 0x1f0   : > { %v4330_v45 = vadd.f32 1.2180176, %v4314_v39  ;;  %v4317_v51 = vmul.f32 %v4301_v43, %v4269_v12 }
 0x1f1   : > { %v4331_v50 = vadd.f32 1.2180176, %v4315_v41  ;;  %v4316_v61 = vmul.f32 %v4300_v21, %v4268_v48 }
 0x1f2   : > { %v4386_v32 = vsel %vm4370_vm14, %v4330_v45, 0.0  ;;  %v4333_v53 = vadd.f32 1.2180176, %v4317_v51 }
 0x1f3   : > { %v4387_v47 = vsel %vm4371_vm15, %v4331_v50, 0.0  ;;  %v4402_v58 = vsel %vm4350_vm2, %v5460_v54, %v4386_v32  ;;  %v4332_v49 = vadd.f32 1.2180176, %v4316_v61 }
 0x1f4   : > { %v4403_v55 = vsel %vm4351_vm0, %v5458_v46, %v4387_v47  ;;  %v4389_v57 = vsel %vm4373_vm1, %v4333_v53, 0.0 }
 0x1f5   : > { %4836 = vmatprep.subr.mxu0 %v4403_v55  ;;  %v4405_v60 = vsel %vm4353_vm3, %v5462_v56, %v4389_v57  ;;  %v4388_v63 = vsel %vm4372_vm4, %v4332_v49, 0.0 }
 0x1f6   : > { %4837 = vmatpush1.msra.mxu0 %v4402_v58  ;;  %4907 = vmatprep.subr.mxu1 %v4405_v60  ;;  %v4404_v1 = vsel %vm4352_vm5, %v5464_v62, %v4388_v63 }
 0x1f7   : > { %5174 = vmatmul.mubr.msk.f32.vlgmr.msra.gmra.mrb[14].mxu0 %vm4406_vm13, %v6155_v7  ;;  %4908 = vmatpush1.msra.mxu1 %v4404_v1 }
 0x1f8   : > { %5175 = vmatmul.mubr.msk.f32.vlgmr.msra.gmra.mrb[14].mxu1 %vm4406_vm13, %v6155_v7 }
 0x246   : > { %v4476_v2 = vpop.f32.mrb[8].mxu0 }
 0x247   : > { %v4478_v3 = vpop.f32.mrb[9].mxu0  ;;  %v4547_v42 = vpop.f32.mrb[8].mxu1 }
 0x248   : > { %v4994_v25 = vcombine.low %v4476_v2, %v4478_v3  ;;  %v4549_v59 = vpop.f32.mrb[9].mxu1 }
 0x249   : > { %v4995_v0 = vcombine.low %v4547_v42, %v4549_v59 }
 0x24a   : > { %5010 = vst [vmem:[%s6380_s27] sm:$0xff] %v4994_v25 }
 0x24b   : > { %5011 = vst [vmem:[%s6380_s27 + $0x8] sm:$0xff] %v4995_v0 }
 0x272   : > { %v4618_v7 = vpop.f32.mrb[10].mxu0 }
 0x273   : > { %v4620_v20 = vpop.f32.mrb[11].mxu0  ;;  %v4689_v4 = vpop.f32.mrb[10].mxu1 }
 0x274   : > { %v4996_v33 = vcombine.low %v4618_v7, %v4620_v20  ;;  %v4691_v5 = vpop.f32.mrb[11].mxu1 }
 0x275   : > { %v4997_v6 = vcombine.low %v4689_v4, %v4691_v5 }
 0x276   : > { %5012 = vst [vmem:[%s6380_s27 + $0x10] sm:$0xff] %v4996_v33 }
 0x277   : > { %5013 = vst [vmem:[%s6380_s27 + $0x18] sm:$0xff] %v4997_v6 }
 0x29e   : > { %v4760_v8 = vpop.f32.mrb[12].mxu0 }
 0x29f   : > { %v4762_v10 = vpop.f32.mrb[13].mxu0  ;;  %v4831_v14 = vpop.f32.mrb[12].mxu1 }
 0x2a0   : > { %v4998_v11 = vcombine.low %v4760_v8, %v4762_v10  ;;  %v4833_v16 = vpop.f32.mrb[13].mxu1 }
 0x2a1   : > { %v4999_v17 = vcombine.low %v4831_v14, %v4833_v16 }
 0x2a2   : > { %5014 = vst [vmem:[%s6380_s27 + $0x20] sm:$0xff] %v4998_v11 }
 0x2a3   : > { %5015 = vst [vmem:[%s6380_s27 + $0x28] sm:$0xff] %v4999_v17 }
 0x2ca   : > { %v4902_v9 = vpop.f32.mrb[14].mxu0 }
 0x2cb   : > { %v4904_v15 = vpop.f32.mrb[15].mxu0  ;;  %v4973_v19 = vpop.f32.mrb[14].mxu1 }
 0x2cc   : > { %v5000_v18 = vcombine.low %v4902_v9, %v4904_v15  ;;  %v4975_v22 = vpop.f32.mrb[15].mxu1 }
 0x2cd   : > { %v5001_v23 = vcombine.low %v4973_v19, %v4975_v22 }
 0x2ce   : > { %5016 = vst [vmem:[%s6380_s27 + $0x30] sm:$0xff] %v5000_v18 }
 0x2cf   : > { %5017 = vst [vmem:[%s6380_s27 + $0x38] sm:$0xff] %v5001_v23 }
 0x2d0   : > { %5508 = shalt.err (!%p5505_p3)
}
 0x2d1   : > { %s5509_s29 = scalar_lea.hbm %s6395_s11, 1024  ;;  %s5513_s30 = scalar_lea.hbm %s6464_s4, 4096 }
 0x2d2   : > { %p5510_p12 = scmp.ne.s32.totalorder %s6395_s11, %s5509_s29  ;;  %p5514_p6 = scmp.lt.u32.totalorder %s6395_s11, %s6464_s4 }
 0x2d3   : > { %p5515_p9 = scmp.lt.u32.totalorder %s5513_s30, %s5509_s29  ;;  %p5517_p8 = scmp.lt.u32.totalorder %s5509_s29, %s6395_s11 }
 0x2d4   : > { %p5511_p0 = pnand %p5510_p12, %p6477_p2 }
 0x2d5   : > { %p5516_p13 = por %p5515_p9, %p5514_p6 }
 0x2d6   : > { %p5512_p5 = pneg %p5511_p0 }
 0x2d7   : > { %p5518_p4 = por %p5517_p8, %p5516_p13 }
 0x2d9   : > { %p5519_p11 = pnand %p5518_p4, %p5512_p5 }
 0x2db   : > { %5522 = shalt.err (!%p5519_p11)
}
 0x2dc   : > { %5281 = dma.vmem_to_hbm [thread:$0]  (%p6477_p2), %s6397_s28, 1024, %s6395_s11, %s5019_s21  }
 0x2dd PF: > { %p5292_p1 = scmp.ge.s32.totalorder %s5617_s25, 2  ;;  %s5047_s6 = sand.u32 1, %s5577_s15  }
 0x2de   : > { %p6478_p7 = scmp.ne.s32.totalorder %s6473_s14, 0  ;;  %s5048_s22 = scalar_lea.sflag [#allocation4], %s5047_s6 }
 0x2e0   : > { %p5288_p10 = pnand %p5292_p1, %p6478_p7 }
 0x2e2   : > { %5572 = dma.done.wait (!%p5288_p10), %s5048_s22, 1024  }
 0x2e3   : > { %5574 = vsyncadd (!%p5288_p10), %s5048_s22, 4294966272  ;;  %s20_s25 = sadd.s32 1, %s5617_s25   ;;  %s6479_s13 = sld [smem:[#allocation8_spill]] }
 0x2e4   : > { %p17_p3 = scmp.ge.s32.totalorder %s20_s25, 6   ;;  %s6480_s28 = sld [smem:[#allocation9_spill]] }
 0x2e5   : > { %s6481_s15 = smov %s5581_s16  ;;  %s6482_s16 = smov %s5585_s17 }
 0x2e6   : > { %s6483_s17 = smov %s5740_s12  ;;  %s6484_s18 = smov %s5593_s19 }
 0x2e7   : > { %s6485_s19 = smov %s5597_s20  ;;  %s6486_s20 = smov %s5726_s7 }
 0x2e8   : > { %s6487_s21 = smov %s5609_s23  ;;  %s6488_s22 = smov %s5613_s24 }
 0x2e9   : > { %s6489_s23 = smov %s6479_s13  ;;  %19 = sbr.rel (!%p17_p3) target bundleno = 9 (0x9), region = 90 }
 0x2ea   : > { %s6490_s24 = smov %s6480_s28 }
 0x2f0   :  { %5053 = vsyncpa [#allocation3], 1 }
 0x2f1   :  { %5055 = vsyncpa [#allocation3 + $0x1], 1 }
 0x2f2   :  { %5056 = vsyncpa [#allocation4], 1 }
 0x2f3   :  { %5058 = vsyncpa [#allocation4 + $0x1], 1 }

</bundles_post_ra>
